<compile_context>
chip_gen: v6e
topology: v6e:2x2x1
jax: 0.10.0
libtpu: 0.0.40
codegen_flags: <defaults>
</compile_context>

<pallas_src>
import functools
import math

import jax
import jax.numpy as jnp
from jax.experimental import pallas as pl
from jax.experimental.pallas import tpu as pltpu


# ----------------------------------------------------------------------------
# Tiling helpers: clamp tile to the dim, pad non-divisible dims with zeros.
# ----------------------------------------------------------------------------
def _pick_tile(dim, requested):
    return dim if dim <= requested else requested


def _pad_axis(x, multiple, axis):
    pad = (-x.shape[axis]) % multiple
    if pad == 0:
        return x
    widths = [(0, 0)] * x.ndim
    widths[axis] = (0, pad)
    return jnp.pad(x, widths)


# ----------------------------------------------------------------------------
# Tiled linear (+ optional fused activation).  x/w are bf16, acc/epilogue f32.
# ----------------------------------------------------------------------------
def _linear_kernel(x_ref, w_ref, b_ref, o_ref, acc_ref, *, activation):
    @pl.when(pl.program_id(2) == 0)
    def _():
        acc_ref[...] = jnp.zeros_like(acc_ref)

    acc_ref[...] += jnp.dot(x_ref[...], w_ref[...],
                            preferred_element_type=jnp.float32)

    @pl.when(pl.program_id(2) == pl.num_programs(2) - 1)
    def _():
        y = acc_ref[...] + b_ref[...]                       # f32 epilogue
        if activation == "gelu":
            # TODO(synk): BERT uses exact erf-GELU; tanh approximation used here.
            c = math.sqrt(2.0 / math.pi)
            y = 0.5 * y * (1.0 + jnp.tanh(c * (y + 0.044715 * y * y * y)))
        elif activation == "tanh":
            y = jnp.tanh(y)
        o_ref[...] = y.astype(o_ref.dtype)


def linear(x, w, b, activation=None, out_dtype=jnp.bfloat16,
           tm=256, tn=512, tk=512):
    M, K = x.shape
    N = w.shape[1]
    tm, tn, tk = _pick_tile(M, tm), _pick_tile(N, tn), _pick_tile(K, tk)
    xp = _pad_axis(_pad_axis(x, tm, 0), tk, 1)
    wp = _pad_axis(_pad_axis(w, tk, 0), tn, 1)
    bp = _pad_axis(b.reshape(1, N), tn, 1)
    Mp, Kp = xp.shape
    Np = wp.shape[1]
    grid = (Mp // tm, Np // tn, Kp // tk)
    out = pl.pallas_call(
        functools.partial(_linear_kernel, activation=activation),
        grid=grid,
        in_specs=[
            pl.BlockSpec((tm, tk), lambda i, j, k: (i, k)),
            pl.BlockSpec((tk, tn), lambda i, j, k: (k, j)),
            pl.BlockSpec((1, tn), lambda i, j, k: (0, j)),
        ],
        out_specs=pl.BlockSpec((tm, tn), lambda i, j, k: (i, j)),
        out_shape=jax.ShapeDtypeStruct((Mp, Np), out_dtype),
        scratch_shapes=[pltpu.VMEM((tm, tn), jnp.float32)],
        compiler_params=pltpu.CompilerParams(
            dimension_semantics=("parallel", "parallel", "arbitrary")),
    )(xp, wp, bp)
    if (Mp, Np) != (M, N):
        out = out[:M, :N]
    return out


# ----------------------------------------------------------------------------
# linear + residual-add + LayerNorm fused into the K-finalize epilogue.
# (N == hidden size, kept un-tiled so LN stats are computable on the last K step.)
# ----------------------------------------------------------------------------
def _linear_ln_kernel(x_ref, w_ref, b_ref, r_ref, g_ref, bb_ref, o_ref, acc_ref):
    @pl.when(pl.program_id(1) == 0)
    def _():
        acc_ref[...] = jnp.zeros_like(acc_ref)

    acc_ref[...] += jnp.dot(x_ref[...], w_ref[...],
                            preferred_element_type=jnp.float32)

    @pl.when(pl.program_id(1) == pl.num_programs(1) - 1)
    def _():
        y = acc_ref[...] + b_ref[...] + r_ref[...].astype(jnp.float32)
        mean = jnp.mean(y, axis=-1, keepdims=True)
        var = jnp.mean((y - mean) ** 2, axis=-1, keepdims=True)
        inv = jax.lax.rsqrt(var + 1e-12)                    # BERT LayerNorm eps
        o_ref[...] = ((y - mean) * inv * g_ref[...] + bb_ref[...]).astype(o_ref.dtype)


def linear_residual_layernorm(x, w, b, residual, gamma, beta,
                              out_dtype=jnp.bfloat16, tm=256, tk=512):
    M, K = x.shape
    N = w.shape[1]
    tm, tk = _pick_tile(M, tm), _pick_tile(K, tk)
    xp = _pad_axis(_pad_axis(x, tm, 0), tk, 1)
    rp = _pad_axis(residual, tm, 0)
    wp = _pad_axis(w, tk, 0)
    Mp, Kp = xp.shape
    grid = (Mp // tm, Kp // tk)
    out = pl.pallas_call(
        _linear_ln_kernel,
        grid=grid,
        in_specs=[
            pl.BlockSpec((tm, tk), lambda i, k: (i, k)),
            pl.BlockSpec((tk, N), lambda i, k: (k, 0)),
            pl.BlockSpec((1, N), lambda i, k: (0, 0)),
            pl.BlockSpec((tm, N), lambda i, k: (i, 0)),
            pl.BlockSpec((1, N), lambda i, k: (0, 0)),
            pl.BlockSpec((1, N), lambda i, k: (0, 0)),
        ],
        out_specs=pl.BlockSpec((tm, N), lambda i, k: (i, 0)),
        out_shape=jax.ShapeDtypeStruct((Mp, N), out_dtype),
        scratch_shapes=[pltpu.VMEM((tm, N), jnp.float32)],
        compiler_params=pltpu.CompilerParams(
            dimension_semantics=("parallel", "arbitrary")),
    )(xp, wp, b.reshape(1, N), rp, gamma.reshape(1, N), beta.reshape(1, N))
    if Mp != M:
        out = out[:M]
    return out


# ----------------------------------------------------------------------------
# Standalone LayerNorm (embeddings only).  bf16 in / bf16 out, f32 stats.
# ----------------------------------------------------------------------------
def _layernorm_kernel(x_ref, g_ref, b_ref, o_ref):
    x = x_ref[...].astype(jnp.float32)
    mean = jnp.mean(x, axis=-1, keepdims=True)
    var = jnp.mean((x - mean) ** 2, axis=-1, keepdims=True)
    inv = jax.lax.rsqrt(var + 1e-12)
    o_ref[...] = ((x - mean) * inv * g_ref[...] + b_ref[...]).astype(o_ref.dtype)


def layernorm(x, gamma, beta, out_dtype=jnp.bfloat16, tm=256):
    M, H = x.shape
    tm = _pick_tile(M, tm)
    xp = _pad_axis(x, tm, 0)
    Mp = xp.shape[0]
    out = pl.pallas_call(
        _layernorm_kernel,
        grid=(Mp // tm,),
        in_specs=[pl.BlockSpec((tm, H), lambda i: (i, 0)),
                  pl.BlockSpec((1, H), lambda i: (0, 0)),
                  pl.BlockSpec((1, H), lambda i: (0, 0))],
        out_specs=pl.BlockSpec((tm, H), lambda i: (i, 0)),
        out_shape=jax.ShapeDtypeStruct((Mp, H), out_dtype),
        compiler_params=pltpu.CompilerParams(dimension_semantics=("parallel",)),
    )(xp, gamma.reshape(1, H), beta.reshape(1, H))
    if Mp != M:
        out = out[:M]
    return out


# ----------------------------------------------------------------------------
# Attention: one grid step = (batch element, query tile), all heads.
# Per-head context is written straight into its output lane slice.
# ----------------------------------------------------------------------------
def _attention_kernel(qkv_ref, mask_ref, o_ref, *, num_heads, scale, tq):
    qi = pl.program_id(1)
    H3 = qkv_ref.shape[-1]
    H = H3 // 3
    dh = H // num_heads
    q_start = pl.multiple_of(qi * tq, tq)
    bias = (1.0 - mask_ref[0].astype(jnp.float32)) * -10000.0      # (1, S) additive mask
    # TODO(synk): at BERT-base dh=64 head slices straddle the 128-lane tile; a
    # head-pair (128-lane aligned) wqkv layout would make these free view-slices.
    for h in range(num_heads):                                     # static unroll over heads
        q = qkv_ref[0, pl.ds(q_start, tq), h * dh:(h + 1) * dh]
        k = qkv_ref[0, :, H + h * dh:H + (h + 1) * dh]
        v = qkv_ref[0, :, 2 * H + h * dh:2 * H + (h + 1) * dh]
        s = jax.lax.dot_general(q, k, (((1,), (1,)), ((), ())),
                                preferred_element_type=jnp.float32) * scale + bias
        s = s - jnp.max(s, axis=-1, keepdims=True)
        p = jnp.exp(s)
        p = p * pl.reciprocal(jnp.sum(p, axis=-1, keepdims=True), approx=True)
        ctx = jnp.dot(p.astype(v.dtype), v, preferred_element_type=jnp.float32)
        o_ref[0, :, h * dh:(h + 1) * dh] = ctx.astype(o_ref.dtype)


def attention(qkv, mask3d, num_heads, scale, tq=256):
    B, S, H3 = qkv.shape
    H = H3 // 3
    tq = _pick_tile(S, tq)
    qkv_p = _pad_axis(qkv, tq, 1)
    mask_p = _pad_axis(mask3d, tq, 2)          # padded keys get mask=0 -> -1e4 bias
    Sp = qkv_p.shape[1]
    out = pl.pallas_call(
        functools.partial(_attention_kernel, num_heads=num_heads, scale=scale, tq=tq),
        grid=(B, Sp // tq),
        in_specs=[
            pl.BlockSpec((1, Sp, H3), lambda b, qi: (b, 0, 0)),   # resident across qi
            pl.BlockSpec((1, 1, Sp), lambda b, qi: (b, 0, 0)),
        ],
        out_specs=pl.BlockSpec((1, tq, H), lambda b, qi: (b, qi, 0)),
        out_shape=jax.ShapeDtypeStruct((B, Sp, H), jnp.bfloat16),
        compiler_params=pltpu.CompilerParams(
            dimension_semantics=("parallel", "parallel")),
    )(qkv_p, mask_p)
    if Sp != S:
        out = out[:, :S]
    return out


# ----------------------------------------------------------------------------
# rel_fc + argmax + CrossEntropyLoss (fused, f32 — rel_num is tiny).
# logits output dropped (unused by the caller).
# ----------------------------------------------------------------------------
def _classifier_kernel(state_ref, w_ref, b_ref, label_ref, loss_ref, pred_ref):
    logits = jnp.dot(state_ref[...].astype(jnp.float32), w_ref[...],
                     preferred_element_type=jnp.float32) + b_ref[...]
    B, R = logits.shape
    col = jax.lax.broadcasted_iota(jnp.int32, (B, R), 1)
    mx = jnp.max(logits, axis=-1, keepdims=True)
    idx = jnp.min(jnp.where(logits == mx, col, R), axis=-1, keepdims=True)
    pred_ref[...] = idx.astype(jnp.int32)
    label = label_ref[...]                                      # (B, 1) int32
    # TODO(synk): label could live in SMEM; kept in VMEM for the vectorized compare.
    lse = jnp.log(jnp.sum(jnp.exp(logits - mx), axis=-1, keepdims=True)) + mx
    picked = jnp.sum(jnp.where(col == label, logits, 0.0), axis=-1, keepdims=True)
    losses = lse - picked                                       # (B, 1)
    loss_ref[...] = jnp.sum(losses, axis=0, keepdims=True) / float(B)


def classifier_with_loss(state, w, b, label):
    B, K = state.shape
    R = w.shape[1]
    return pl.pallas_call(
        _classifier_kernel,
        grid=(1,),
        in_specs=[
            pl.BlockSpec((B, K), lambda i: (0, 0)),
            pl.BlockSpec((K, R), lambda i: (0, 0)),
            pl.BlockSpec((1, R), lambda i: (0, 0)),
            pl.BlockSpec((B, 1), lambda i: (0, 0)),
        ],
        out_specs=[
            pl.BlockSpec((1, 1), lambda i: (0, 0)),
            pl.BlockSpec((B, 1), lambda i: (0, 0)),
        ],
        out_shape=(
            jax.ShapeDtypeStruct((1, 1), jnp.float32),
            jax.ShapeDtypeStruct((B, 1), jnp.int32),
        ),
    )(state, w, b.reshape(1, R), label.reshape(B, 1).astype(jnp.int32))


# ----------------------------------------------------------------------------
# Parameter construction (deterministic, synthetic "bert-base"-shaped mini model)
# ----------------------------------------------------------------------------
class Config:
    vocab_size = 64
    hidden_size = 32
    num_heads = 4
    num_layers = 2
    intermediate_size = 64
    max_position = 16
    type_vocab_size = 2
    rel_num = 5
    output_representation = "entity_marker"   # scale = 2


def init_params(cfg, key):
    H, I = cfg.hidden_size, cfg.intermediate_size
    keys = iter(jax.random.split(key, 256))

    def norm(shape, s=0.02):
        return jax.random.normal(next(keys), shape, jnp.float32) * s

    params = {
        "word_emb": norm((cfg.vocab_size, H)),
        "pos_emb": norm((cfg.max_position, H)),
        "tok_emb": norm((cfg.type_vocab_size, H)),
        "emb_ln_g": jnp.ones((H,), jnp.float32),
        "emb_ln_b": jnp.zeros((H,), jnp.float32),
        "layers": [],
        # rel_fc kept in f32 (tiny; keeps argmax tie-breaking exact)
        "rel_fc_w": norm((2 * H, cfg.rel_num)),   # entity_marker -> scale 2
        "rel_fc_b": jnp.zeros((cfg.rel_num,), jnp.float32),
    }
    for _ in range(cfg.num_layers):
        wq, wk, wv = norm((H, H)), norm((H, H)), norm((H, H))
        params["layers"].append({
            # fused QKV projection; encoder matmul weights stored bf16
            "wqkv": jnp.concatenate([wq, wk, wv], axis=1).astype(jnp.bfloat16),
            "bqkv": jnp.zeros((3 * H,), jnp.float32),
            "wo": norm((H, H)).astype(jnp.bfloat16), "bo": jnp.zeros((H,), jnp.float32),
            "ln1_g": jnp.ones((H,), jnp.float32), "ln1_b": jnp.zeros((H,), jnp.float32),
            "wi": norm((H, I)).astype(jnp.bfloat16), "bi": jnp.zeros((I,), jnp.float32),
            "wf": norm((I, H)).astype(jnp.bfloat16), "bf": jnp.zeros((H,), jnp.float32),
            "ln2_g": jnp.ones((H,), jnp.float32), "ln2_b": jnp.zeros((H,), jnp.float32),
        })
    return params


# ----------------------------------------------------------------------------
# REModel forward (jit-compiled; cfg is static via functools.partial)
# ----------------------------------------------------------------------------
def re_model_forward(params, input_ids, mask, h_pos, t_pos, label, h_end, t_end, *, cfg):
    B, S = input_ids.shape
    H, nH = cfg.hidden_size, cfg.num_heads
    dh = H // nH

    # --- BERT embeddings (gathers are XLA glue; LayerNorm is a Pallas kernel) ---
    we = jnp.take(params["word_emb"], input_ids, axis=0)              # (B, S, H)
    pe = params["pos_emb"][:S][None, :, :]                            # (1, S, H)
    te = params["tok_emb"][0][None, None, :]                          # token_type_ids == 0
    emb = (we + pe + te).astype(jnp.bfloat16)
    x2d = layernorm(emb.reshape(B * S, H), params["emb_ln_g"], params["emb_ln_b"])
    # TODO(synk): BERT dropout (training mode) omitted for determinism.

    mask3d = mask.astype(jnp.float32).reshape(B, 1, S)                # shared across heads
    scale = 1.0 / math.sqrt(dh)

    for lp in params["layers"]:
        # fused QKV projection -> (B*S, 3H) bf16, no head-split transposes
        qkv = linear(x2d, lp["wqkv"], lp["bqkv"], out_dtype=jnp.bfloat16)
        ctx = attention(qkv.reshape(B, S, 3 * H), mask3d, nH, scale)  # (B, S, H) bf16
        # wo matmul + residual + LN fused; bf16 out
        x2d = linear_residual_layernorm(ctx.reshape(B * S, H), lp["wo"], lp["bo"],
                                        residual=x2d,
                                        gamma=lp["ln1_g"], beta=lp["ln1_b"])
        inter = linear(x2d, lp["wi"], lp["bi"], activation="gelu",
                       out_dtype=jnp.bfloat16)                        # (B*S, I) bf16
        # wf matmul + residual + LN fused; bf16 out
        x2d = linear_residual_layernorm(inter, lp["wf"], lp["bf"],
                                        residual=x2d,
                                        gamma=lp["ln2_g"], beta=lp["ln2_b"])

    last_hidden = x2d.reshape(B, S, H)
    # pooler_output is computed by BertModel but unused by the 'entity_marker' head.

    # --- entity_marker representation ---
    indice = jnp.arange(B)
    h_state = last_hidden[indice, h_pos]                               # (B, H)
    t_state = last_hidden[indice, t_pos]                               # (B, H)
    state = jnp.concatenate([h_state, t_state], axis=1)                # (B, 2H)

    # --- rel_fc + argmax + CrossEntropyLoss (fused Pallas kernel) ---
    loss, pred = classifier_with_loss(
        state, params["rel_fc_w"], params["rel_fc_b"], label)
    # training == True  ->  return (loss, output)
    return loss[0, 0], pred[:, 0]


# ----------------------------------------------------------------------------
# Main
# ----------------------------------------------------------------------------
if __name__ == "__main__":
    cfg = Config()
    key = jax.random.PRNGKey(0)
    pkey, ikey, lkey = jax.random.split(key, 3)

    params = init_params(cfg, pkey)

    B, S = 2, 8
    input_ids = jax.random.randint(ikey, (B, S), 0, cfg.vocab_size, dtype=jnp.int32)
    mask = jnp.array([[1, 1, 1, 1, 1, 1, 1, 1],
                      [1, 1, 1, 1, 1, 1, 0, 0]], dtype=jnp.float32)
    h_pos = jnp.array([1, 2], dtype=jnp.int32)
    t_pos = jnp.array([4, 5], dtype=jnp.int32)
    h_end = jnp.array([2, 3], dtype=jnp.int32)
    t_end = jnp.array([5, 6], dtype=jnp.int32)
    label = jax.random.randint(lkey, (B,), 0, cfg.rel_num, dtype=jnp.int32)

    forward = jax.jit(functools.partial(re_model_forward, cfg=cfg))
    loss, output = forward(params, input_ids, mask, h_pos, t_pos, label, h_end, t_end)
    jax.block_until_ready((loss, output))
    assert loss.shape == () and output.shape == (B,)
    print("KERNEL_OK")
</pallas_src>

<mosaic_0001>
module attributes {stable_mosaic.version = 11 : i64} {
  func.func @_linear_kernel(%arg0: i32, %arg1: i32, %arg2: i32, %arg3: memref<16x32xbf16, #tpu.memory_space<vmem>>, %arg4: memref<32x96xbf16, #tpu.memory_space<vmem>>, %arg5: memref<1x96xf32, #tpu.memory_space<vmem>>, %arg6: memref<16x96xbf16, #tpu.memory_space<vmem>>, %arg7: memref<16x96xf32, #tpu.memory_space<vmem>>) attributes {dimension_semantics = [#tpu.dimension_semantics<parallel>, #tpu.dimension_semantics<parallel>, #tpu.dimension_semantics<arbitrary>], iteration_bounds = array<i64: 1, 1, 1>, scalar_prefetch = 0 : i64, scratch_operands = 1 : i64, tpu.core_type = #tpu.core_type<tc>, window_params = [{transform_indices = @transform_0, window_bounds = array<i64: 16, 32>}, {transform_indices = @transform_1, window_bounds = array<i64: 32, 96>}, {transform_indices = @transform_2, window_bounds = array<i64: 1, 96>}, {transform_indices = @transform_3, window_bounds = array<i64: 16, 96>}]} {
    %c0_i32 = arith.constant 0 : i32
    %0 = arith.cmpi eq, %arg2, %c0_i32 : i32
    %1 = arith.extui %0 : i1 to i32
    %c0_i32_0 = arith.constant 0 : i32
    %2 = arith.cmpi ne, %1, %c0_i32_0 : i32
    scf.if %2 {
      %cst_10 = arith.constant 0.000000e+00 : f32
      %12 = vector.broadcast %cst_10 : f32 to vector<16x96xf32>
      %c0_11 = arith.constant 0 : index
      %c0_12 = arith.constant 0 : index
      %13 = vector.load %arg7[%c0_11, %c0_12] : memref<16x96xf32, #tpu.memory_space<vmem>>, vector<16x96xf32>
      tpu.vector_store %arg7[%c0_11, %c0_12], %12 {strides = array<i32>} : memref<16x96xf32, #tpu.memory_space<vmem>>, vector<16x96xf32>,
    } else {
    }
    %c0 = arith.constant 0 : index
    %c0_1 = arith.constant 0 : index
    %3 = vector.load %arg7[%c0, %c0_1] : memref<16x96xf32, #tpu.memory_space<vmem>>, vector<16x96xf32>
    %c0_2 = arith.constant 0 : index
    %c0_3 = arith.constant 0 : index
    %4 = vector.load %arg3[%c0_2, %c0_3] : memref<16x32xbf16, #tpu.memory_space<vmem>>, vector<16x32xbf16>
    %c0_4 = arith.constant 0 : index
    %c0_5 = arith.constant 0 : index
    %5 = vector.load %arg4[%c0_4, %c0_5] : memref<32x96xbf16, #tpu.memory_space<vmem>>, vector<32x96xbf16>
    %cst = arith.constant dense<0.000000e+00> : vector<16x96xf32>
    %6 = tpu.matmul %4, %5, %cst {dimension_numbers = #tpu.dot_dimension_numbers<[1], [0], [0], [1], [0, 0, 1, 1], [], []>} : vector<16x32xbf16>, vector<32x96xbf16>, vector<16x96xf32> -> vector<16x96xf32>
    %7 = arith.addf %3, %6 : vector<16x96xf32>
    %c0_6 = arith.constant 0 : index
    %c0_7 = arith.constant 0 : index
    %8 = vector.load %arg7[%c0_6, %c0_7] : memref<16x96xf32, #tpu.memory_space<vmem>>, vector<16x96xf32>
    tpu.vector_store %arg7[%c0_6, %c0_7], %7 {strides = array<i32>} : memref<16x96xf32, #tpu.memory_space<vmem>>, vector<16x96xf32>,
    %c0_i32_8 = arith.constant 0 : i32
    %9 = arith.cmpi eq, %arg2, %c0_i32_8 : i32
    %10 = arith.extui %9 : i1 to i32
    %c0_i32_9 = arith.constant 0 : i32
    %11 = arith.cmpi ne, %10, %c0_i32_9 : i32
    scf.if %11 {
      %c0_10 = arith.constant 0 : index
      %c0_11 = arith.constant 0 : index
      %12 = vector.load %arg7[%c0_10, %c0_11] : memref<16x96xf32, #tpu.memory_space<vmem>>, vector<16x96xf32>
      %c0_12 = arith.constant 0 : index
      %c0_13 = arith.constant 0 : index
      %13 = vector.load %arg5[%c0_12, %c0_13] : memref<1x96xf32, #tpu.memory_space<vmem>>, vector<1x96xf32>
      %14 = vector.broadcast %13 : vector<1x96xf32> to vector<16x96xf32>
      %15 = arith.addf %12, %14 : vector<16x96xf32>
      %16 = arith.truncf %15 : vector<16x96xf32> to vector<16x96xbf16>
      %c0_14 = arith.constant 0 : index
      %c0_15 = arith.constant 0 : index
      %17 = vector.load %arg6[%c0_14, %c0_15] : memref<16x96xbf16, #tpu.memory_space<vmem>>, vector<16x96xbf16>
      tpu.vector_store %arg6[%c0_14, %c0_15], %16 {strides = array<i32>} : memref<16x96xbf16, #tpu.memory_space<vmem>>, vector<16x96xbf16>,
    } else {
    }
    return
  }
  func.func @transform_0(%arg0: i32, %arg1: i32, %arg2: i32) -> (i32, i32) {
    %c0_i32 = arith.constant 0 : i32
    return %arg0, %arg2 : i32, i32
  }
  func.func @transform_1(%arg0: i32, %arg1: i32, %arg2: i32) -> (i32, i32) {
    %c0_i32 = arith.constant 0 : i32
    return %arg2, %arg1 : i32, i32
  }
  func.func @transform_2(%arg0: i32, %arg1: i32, %arg2: i32) -> (i32, i32) {
    %c0_i32 = arith.constant 0 : i32
    %c0_i32_0 = arith.constant 0 : i32
    return %c0_i32, %arg1 : i32, i32
  }
  func.func @transform_3(%arg0: i32, %arg1: i32, %arg2: i32) -> (i32, i32) {
    %c0_i32 = arith.constant 0 : i32
    return %arg0, %arg1 : i32, i32
  }
}

module attributes {stable_mosaic.version = 11 : i64} {
  func.func @_attention_kernel(%arg0: i32, %arg1: i32, %arg2: memref<1x8x96xbf16, #tpu.memory_space<vmem>>, %arg3: memref<1x1x8xf32, #tpu.memory_space<vmem>>, %arg4: memref<1x8x32xbf16, #tpu.memory_space<vmem>>) attributes {dimension_semantics = [#tpu.dimension_semantics<parallel>, #tpu.dimension_semantics<parallel>], iteration_bounds = array<i64: 2, 1>, scalar_prefetch = 0 : i64, scratch_operands = 0 : i64, tpu.core_type = #tpu.core_type<tc>, window_params = [{transform_indices = @transform_0, window_bounds = array<i64: 1, 8, 96>}, {transform_indices = @transform_1, window_bounds = array<i64: 1, 1, 8>}, {transform_indices = @transform_2, window_bounds = array<i64: 1, 8, 32>}]} {
    %c8_i32 = arith.constant 8 : i32
    %0 = arith.muli %arg1, %c8_i32 : i32
    %1 = tpu.assume_multiple %0, 8 : i32
    %c0 = arith.constant 0 : index
    %c0_0 = arith.constant 0 : index
    %c0_1 = arith.constant 0 : index
    %2 = vector.load %arg3[%c0, %c0_0, %c0_1] : memref<1x1x8xf32, #tpu.memory_space<vmem>>, vector<1x1x8xf32>
    %3 = vector.shape_cast %2 : vector<1x1x8xf32> to vector<1x8xf32>
    %cst = arith.constant 1.000000e+00 : f32
    %4 = vector.broadcast %cst : f32 to vector<1x8xf32>
    %5 = arith.subf %4, %3 : vector<1x8xf32>
    %cst_2 = arith.constant -1.000000e+04 : f32
    %6 = vector.broadcast %cst_2 : f32 to vector<1x8xf32>
    %7 = arith.mulf %5, %6 : vector<1x8xf32>
    %c0_3 = arith.constant 0 : index
    %8 = arith.index_cast %1 : i32 to index
    %c0_4 = arith.constant 0 : index
    %9 = vector.load %arg2[%c0_3, %8, %c0_4] : memref<1x8x96xbf16, #tpu.memory_space<vmem>>, vector<1x8x8xbf16>
    %10 = vector.shape_cast %9 : vector<1x8x8xbf16> to vector<8x8xbf16>
    %c0_5 = arith.constant 0 : index
    %c0_6 = arith.constant 0 : index
    %c32 = arith.constant 32 : index
    %11 = vector.load %arg2[%c0_5, %c0_6, %c32] : memref<1x8x96xbf16, #tpu.memory_space<vmem>>, vector<1x8x8xbf16>
    %12 = vector.shape_cast %11 : vector<1x8x8xbf16> to vector<8x8xbf16>
    %c0_7 = arith.constant 0 : index
    %c0_8 = arith.constant 0 : index
    %c64 = arith.constant 64 : index
    %13 = vector.load %arg2[%c0_7, %c0_8, %c64] : memref<1x8x96xbf16, #tpu.memory_space<vmem>>, vector<1x8x8xbf16>
    %14 = vector.shape_cast %13 : vector<1x8x8xbf16> to vector<8x8xbf16>
    %cst_9 = arith.constant dense<0.000000e+00> : vector<8x8xf32>
    %15 = tpu.matmul %10, %12, %cst_9 {dimension_numbers = #tpu.dot_dimension_numbers<[1], [1], [0], [0], [0, 0, 1, 0], [], []>} : vector<8x8xbf16>, vector<8x8xbf16>, vector<8x8xf32> -> vector<8x8xf32>
    %cst_10 = arith.constant 0.353553385 : f32
    %16 = vector.broadcast %cst_10 : f32 to vector<8x8xf32>
    %17 = arith.mulf %15, %16 : vector<8x8xf32>
    %18 = vector.broadcast %7 : vector<1x8xf32> to vector<8x8xf32>
    %19 = arith.addf %17, %18 : vector<8x8xf32>
    %cst_11 = arith.constant dense<0xFF800000> : vector<8xf32>
    %20 = vector.multi_reduction <maximumf>, %19, %cst_11 [1] : vector<8x8xf32> to vector<8xf32>
    %21 = vector.shape_cast %20 : vector<8xf32> to vector<8x1xf32>
    %22 = vector.broadcast %21 : vector<8x1xf32> to vector<8x8xf32>
    %23 = arith.subf %19, %22 : vector<8x8xf32>
    %24 = math.exp %23 : vector<8x8xf32>
    %cst_12 = arith.constant dense<0.000000e+00> : vector<8xf32>
    %25 = vector.multi_reduction <add>, %24, %cst_12 [1] : vector<8x8xf32> to vector<8xf32>
    %26 = vector.shape_cast %25 : vector<8xf32> to vector<8x1xf32>
    %27 = tpu.reciprocal %26 {approx = true} : vector<8x1xf32> -> vector<8x1xf32>
    %28 = vector.broadcast %27 : vector<8x1xf32> to vector<8x8xf32>
    %29 = arith.mulf %24, %28 : vector<8x8xf32>
    %30 = arith.truncf %29 : vector<8x8xf32> to vector<8x8xbf16>
    %cst_13 = arith.constant dense<0.000000e+00> : vector<8x8xf32>
    %31 = tpu.matmul %30, %14, %cst_13 {dimension_numbers = #tpu.dot_dimension_numbers<[1], [0], [0], [1], [0, 0, 1, 1], [], []>} : vector<8x8xbf16>, vector<8x8xbf16>, vector<8x8xf32> -> vector<8x8xf32>
    %32 = arith.truncf %31 : vector<8x8xf32> to vector<8x8xbf16>
    %c0_14 = arith.constant 0 : index
    %c0_15 = arith.constant 0 : index
    %c0_16 = arith.constant 0 : index
    %33 = vector.load %arg4[%c0_14, %c0_15, %c0_16] : memref<1x8x32xbf16, #tpu.memory_space<vmem>>, vector<1x8x8xbf16>
    %34 = vector.shape_cast %33 : vector<1x8x8xbf16> to vector<8x8xbf16>
    %35 = vector.shape_cast %32 : vector<8x8xbf16> to vector<1x8x8xbf16>
    tpu.vector_store %arg4[%c0_14, %c0_15, %c0_16], %35 {strides = array<i32>} : memref<1x8x32xbf16, #tpu.memory_space<vmem>>, vector<1x8x8xbf16>,
    %c0_17 = arith.constant 0 : index
    %36 = arith.index_cast %1 : i32 to index
    %c8 = arith.constant 8 : index
    %37 = vector.load %arg2[%c0_17, %36, %c8] : memref<1x8x96xbf16, #tpu.memory_space<vmem>>, vector<1x8x8xbf16>
    %38 = vector.shape_cast %37 : vector<1x8x8xbf16> to vector<8x8xbf16>
    %c0_18 = arith.constant 0 : index
    %c0_19 = arith.constant 0 : index
    %c40 = arith.constant 40 : index
    %39 = vector.load %arg2[%c0_18, %c0_19, %c40] : memref<1x8x96xbf16, #tpu.memory_space<vmem>>, vector<1x8x8xbf16>
    %40 = vector.shape_cast %39 : vector<1x8x8xbf16> to vector<8x8xbf16>
    %c0_20 = arith.constant 0 : index
    %c0_21 = arith.constant 0 : index
    %c72 = arith.constant 72 : index
    %41 = vector.load %arg2[%c0_20, %c0_21, %c72] : memref<1x8x96xbf16, #tpu.memory_space<vmem>>, vector<1x8x8xbf16>
    %42 = vector.shape_cast %41 : vector<1x8x8xbf16> to vector<8x8xbf16>
    %cst_22 = arith.constant dense<0.000000e+00> : vector<8x8xf32>
    %43 = tpu.matmul %38, %40, %cst_22 {dimension_numbers = #tpu.dot_dimension_numbers<[1], [1], [0], [0], [0, 0, 1, 0], [], []>} : vector<8x8xbf16>, vector<8x8xbf16>, vector<8x8xf32> -> vector<8x8xf32>
    %cst_23 = arith.constant 0.353553385 : f32
    %44 = vector.broadcast %cst_23 : f32 to vector<8x8xf32>
    %45 = arith.mulf %43, %44 : vector<8x8xf32>
    %46 = vector.broadcast %7 : vector<1x8xf32> to vector<8x8xf32>
    %47 = arith.addf %45, %46 : vector<8x8xf32>
    %cst_24 = arith.constant dense<0xFF800000> : vector<8xf32>
    %48 = vector.multi_reduction <maximumf>, %47, %cst_24 [1] : vector<8x8xf32> to vector<8xf32>
    %49 = vector.shape_cast %48 : vector<8xf32> to vector<8x1xf32>
    %50 = vector.broadcast %49 : vector<8x1xf32> to vector<8x8xf32>
    %51 = arith.subf %47, %50 : vector<8x8xf32>
    %52 = math.exp %51 : vector<8x8xf32>
    %cst_25 = arith.constant dense<0.000000e+00> : vector<8xf32>
    %53 = vector.multi_reduction <add>, %52, %cst_25 [1] : vector<8x8xf32> to vector<8xf32>
    %54 = vector.shape_cast %53 : vector<8xf32> to vector<8x1xf32>
    %55 = tpu.reciprocal %54 {approx = true} : vector<8x1xf32> -> vector<8x1xf32>
    %56 = vector.broadcast %55 : vector<8x1xf32> to vector<8x8xf32>
    %57 = arith.mulf %52, %56 : vector<8x8xf32>
    %58 = arith.truncf %57 : vector<8x8xf32> to vector<8x8xbf16>
    %cst_26 = arith.constant dense<0.000000e+00> : vector<8x8xf32>
    %59 = tpu.matmul %58, %42, %cst_26 {dimension_numbers = #tpu.dot_dimension_numbers<[1], [0], [0], [1], [0, 0, 1, 1], [], []>} : vector<8x8xbf16>, vector<8x8xbf16>, vector<8x8xf32> -> vector<8x8xf32>
    %60 = arith.truncf %59 : vector<8x8xf32> to vector<8x8xbf16>
    %c0_27 = arith.constant 0 : index
    %c0_28 = arith.constant 0 : index
    %c8_29 = arith.constant 8 : index
    %61 = vector.load %arg4[%c0_27, %c0_28, %c8_29] : memref<1x8x32xbf16, #tpu.memory_space<vmem>>, vector<1x8x8xbf16>
    %62 = vector.shape_cast %61 : vector<1x8x8xbf16> to vector<8x8xbf16>
    %63 = vector.shape_cast %60 : vector<8x8xbf16> to vector<1x8x8xbf16>
    tpu.vector_store %arg4[%c0_27, %c0_28, %c8_29], %63 {strides = array<i32>} : memref<1x8x32xbf16, #tpu.memory_space<vmem>>, vector<1x8x8xbf16>,
    %c0_30 = arith.constant 0 : index
    %64 = arith.index_cast %1 : i32 to index
    %c16 = arith.constant 16 : index
    %65 = vector.load %arg2[%c0_30, %64, %c16] : memref<1x8x96xbf16, #tpu.memory_space<vmem>>, vector<1x8x8xbf16>
    %66 = vector.shape_cast %65 : vector<1x8x8xbf16> to vector<8x8xbf16>
    %c0_31 = arith.constant 0 : index
    %c0_32 = arith.constant 0 : index
    %c48 = arith.constant 48 : index
    %67 = vector.load %arg2[%c0_31, %c0_32, %c48] : memref<1x8x96xbf16, #tpu.memory_space<vmem>>, vector<1x8x8xbf16>
    %68 = vector.shape_cast %67 : vector<1x8x8xbf16> to vector<8x8xbf16>
    %c0_33 = arith.constant 0 : index
    %c0_34 = arith.constant 0 : index
    %c80 = arith.constant 80 : index
    %69 = vector.load %arg2[%c0_33, %c0_34, %c80] : memref<1x8x96xbf16, #tpu.memory_space<vmem>>, vector<1x8x8xbf16>
    %70 = vector.shape_cast %69 : vector<1x8x8xbf16> to vector<8x8xbf16>
    %cst_35 = arith.constant dense<0.000000e+00> : vector<8x8xf32>
    %71 = tpu.matmul %66, %68, %cst_35 {dimension_numbers = #tpu.dot_dimension_numbers<[1], [1], [0], [0], [0, 0, 1, 0], [], []>} : vector<8x8xbf16>, vector<8x8xbf16>, vector<8x8xf32> -> vector<8x8xf32>
    %cst_36 = arith.constant 0.353553385 : f32
    %72 = vector.broadcast %cst_36 : f32 to vector<8x8xf32>
    %73 = arith.mulf %71, %72 : vector<8x8xf32>
    %74 = vector.broadcast %7 : vector<1x8xf32> to vector<8x8xf32>
    %75 = arith.addf %73, %74 : vector<8x8xf32>
    %cst_37 = arith.constant dense<0xFF800000> : vector<8xf32>
    %76 = vector.multi_reduction <maximumf>, %75, %cst_37 [1] : vector<8x8xf32> to vector<8xf32>
    %77 = vector.shape_cast %76 : vector<8xf32> to vector<8x1xf32>
    %78 = vector.broadcast %77 : vector<8x1xf32> to vector<8x8xf32>
    %79 = arith.subf %75, %78 : vector<8x8xf32>
    %80 = math.exp %79 : vector<8x8xf32>
    %cst_38 = arith.constant dense<0.000000e+00> : vector<8xf32>
    %81 = vector.multi_reduction <add>, %80, %cst_38 [1] : vector<8x8xf32> to vector<8xf32>
    %82 = vector.shape_cast %81 : vector<8xf32> to vector<8x1xf32>
    %83 = tpu.reciprocal %82 {approx = true} : vector<8x1xf32> -> vector<8x1xf32>
    %84 = vector.broadcast %83 : vector<8x1xf32> to vector<8x8xf32>
    %85 = arith.mulf %80, %84 : vector<8x8xf32>
    %86 = arith.truncf %85 : vector<8x8xf32> to vector<8x8xbf16>
    %cst_39 = arith.constant dense<0.000000e+00> : vector<8x8xf32>
    %87 = tpu.matmul %86, %70, %cst_39 {dimension_numbers = #tpu.dot_dimension_numbers<[1], [0], [0], [1], [0, 0, 1, 1], [], []>} : vector<8x8xbf16>, vector<8x8xbf16>, vector<8x8xf32> -> vector<8x8xf32>
    %88 = arith.truncf %87 : vector<8x8xf32> to vector<8x8xbf16>
    %c0_40 = arith.constant 0 : index
    %c0_41 = arith.constant 0 : index
    %c16_42 = arith.constant 16 : index
    %89 = vector.load %arg4[%c0_40, %c0_41, %c16_42] : memref<1x8x32xbf16, #tpu.memory_space<vmem>>, vector<1x8x8xbf16>
    %90 = vector.shape_cast %89 : vector<1x8x8xbf16> to vector<8x8xbf16>
    %91 = vector.shape_cast %88 : vector<8x8xbf16> to vector<1x8x8xbf16>
    tpu.vector_store %arg4[%c0_40, %c0_41, %c16_42], %91 {strides = array<i32>} : memref<1x8x32xbf16, #tpu.memory_space<vmem>>, vector<1x8x8xbf16>,
    %c0_43 = arith.constant 0 : index
    %92 = arith.index_cast %1 : i32 to index
    %c24 = arith.constant 24 : index
    %93 = vector.load %arg2[%c0_43, %92, %c24] : memref<1x8x96xbf16, #tpu.memory_space<vmem>>, vector<1x8x8xbf16>
    %94 = vector.shape_cast %93 : vector<1x8x8xbf16> to vector<8x8xbf16>
    %c0_44 = arith.constant 0 : index
    %c0_45 = arith.constant 0 : index
    %c56 = arith.constant 56 : index
    %95 = vector.load %arg2[%c0_44, %c0_45, %c56] : memref<1x8x96xbf16, #tpu.memory_space<vmem>>, vector<1x8x8xbf16>
    %96 = vector.shape_cast %95 : vector<1x8x8xbf16> to vector<8x8xbf16>
    %c0_46 = arith.constant 0 : index
    %c0_47 = arith.constant 0 : index
    %c88 = arith.constant 88 : index
    %97 = vector.load %arg2[%c0_46, %c0_47, %c88] : memref<1x8x96xbf16, #tpu.memory_space<vmem>>, vector<1x8x8xbf16>
    %98 = vector.shape_cast %97 : vector<1x8x8xbf16> to vector<8x8xbf16>
    %cst_48 = arith.constant dense<0.000000e+00> : vector<8x8xf32>
    %99 = tpu.matmul %94, %96, %cst_48 {dimension_numbers = #tpu.dot_dimension_numbers<[1], [1], [0], [0], [0, 0, 1, 0], [], []>} : vector<8x8xbf16>, vector<8x8xbf16>, vector<8x8xf32> -> vector<8x8xf32>
    %cst_49 = arith.constant 0.353553385 : f32
    %100 = vector.broadcast %cst_49 : f32 to vector<8x8xf32>
    %101 = arith.mulf %99, %100 : vector<8x8xf32>
    %102 = vector.broadcast %7 : vector<1x8xf32> to vector<8x8xf32>
    %103 = arith.addf %101, %102 : vector<8x8xf32>
    %cst_50 = arith.constant dense<0xFF800000> : vector<8xf32>
    %104 = vector.multi_reduction <maximumf>, %103, %cst_50 [1] : vector<8x8xf32> to vector<8xf32>
    %105 = vector.shape_cast %104 : vector<8xf32> to vector<8x1xf32>
    %106 = vector.broadcast %105 : vector<8x1xf32> to vector<8x8xf32>
    %107 = arith.subf %103, %106 : vector<8x8xf32>
    %108 = math.exp %107 : vector<8x8xf32>
    %cst_51 = arith.constant dense<0.000000e+00> : vector<8xf32>
    %109 = vector.multi_reduction <add>, %108, %cst_51 [1] : vector<8x8xf32> to vector<8xf32>
    %110 = vector.shape_cast %109 : vector<8xf32> to vector<8x1xf32>
    %111 = tpu.reciprocal %110 {approx = true} : vector<8x1xf32> -> vector<8x1xf32>
    %112 = vector.broadcast %111 : vector<8x1xf32> to vector<8x8xf32>
    %113 = arith.mulf %108, %112 : vector<8x8xf32>
    %114 = arith.truncf %113 : vector<8x8xf32> to vector<8x8xbf16>
    %cst_52 = arith.constant dense<0.000000e+00> : vector<8x8xf32>
    %115 = tpu.matmul %114, %98, %cst_52 {dimension_numbers = #tpu.dot_dimension_numbers<[1], [0], [0], [1], [0, 0, 1, 1], [], []>} : vector<8x8xbf16>, vector<8x8xbf16>, vector<8x8xf32> -> vector<8x8xf32>
    %116 = arith.truncf %115 : vector<8x8xf32> to vector<8x8xbf16>
    %c0_53 = arith.constant 0 : index
    %c0_54 = arith.constant 0 : index
    %c24_55 = arith.constant 24 : index
    %117 = vector.load %arg4[%c0_53, %c0_54, %c24_55] : memref<1x8x32xbf16, #tpu.memory_space<vmem>>, vector<1x8x8xbf16>
    %118 = vector.shape_cast %117 : vector<1x8x8xbf16> to vector<8x8xbf16>
    %119 = vector.shape_cast %116 : vector<8x8xbf16> to vector<1x8x8xbf16>
    tpu.vector_store %arg4[%c0_53, %c0_54, %c24_55], %119 {strides = array<i32>} : memref<1x8x32xbf16, #tpu.memory_space<vmem>>, vector<1x8x8xbf16>,
    return
  }
  func.func @transform_0(%arg0: i32, %arg1: i32) -> (i32, i32, i32) {
    %c0_i32 = arith.constant 0 : i32
    %c0_i32_0 = arith.constant 0 : i32
    %c0_i32_1 = arith.constant 0 : i32
    return %arg0, %c0_i32, %c0_i32_0 : i32, i32, i32
  }
  func.func @transform_1(%arg0: i32, %arg1: i32) -> (i32, i32, i32) {
    %c0_i32 = arith.constant 0 : i32
    %c0_i32_0 = arith.constant 0 : i32
    %c0_i32_1 = arith.constant 0 : i32
    return %arg0, %c0_i32, %c0_i32_0 : i32, i32, i32
  }
  func.func @transform_2(%arg0: i32, %arg1: i32) -> (i32, i32, i32) {
    %c0_i32 = arith.constant 0 : i32
    %c0_i32_0 = arith.constant 0 : i32
    return %arg0, %arg1, %c0_i32 : i32, i32, i32
  }
}

module attributes {stable_mosaic.version = 11 : i64} {
  func.func @_layernorm_kernel(%arg0: i32, %arg1: memref<16x32xbf16, #tpu.memory_space<vmem>>, %arg2: memref<1x32xf32, #tpu.memory_space<vmem>>, %arg3: memref<1x32xf32, #tpu.memory_space<vmem>>, %arg4: memref<16x32xbf16, #tpu.memory_space<vmem>>) attributes {dimension_semantics = [#tpu.dimension_semantics<parallel>], iteration_bounds = array<i64: 1>, scalar_prefetch = 0 : i64, scratch_operands = 0 : i64, tpu.core_type = #tpu.core_type<tc>, window_params = [{transform_indices = @transform_0, window_bounds = array<i64: 16, 32>}, {pipeline_mode = #tpu.pipeline_mode<synchronous>, transform_indices = @transform_1, window_bounds = array<i64: 1, 32>}, {pipeline_mode = #tpu.pipeline_mode<synchronous>, transform_indices = @transform_2, window_bounds = array<i64: 1, 32>}, {transform_indices = @transform_3, window_bounds = array<i64: 16, 32>}]} {
    %c0 = arith.constant 0 : index
    %c0_0 = arith.constant 0 : index
    %0 = vector.load %arg1[%c0, %c0_0] : memref<16x32xbf16, #tpu.memory_space<vmem>>, vector<16x32xbf16>
    %1 = arith.extf %0 : vector<16x32xbf16> to vector<16x32xf32>
    %cst = arith.constant dense<0.000000e+00> : vector<16xf32>
    %2 = vector.multi_reduction <add>, %1, %cst [1] : vector<16x32xf32> to vector<16xf32>
    %3 = vector.shape_cast %2 : vector<16xf32> to vector<16x1xf32>
    %cst_1 = arith.constant 3.200000e+01 : f32
    %4 = vector.broadcast %cst_1 : f32 to vector<16x1xf32>
    %5 = arith.divf %3, %4 : vector<16x1xf32>
    %6 = vector.broadcast %5 : vector<16x1xf32> to vector<16x32xf32>
    %7 = arith.subf %1, %6 : vector<16x32xf32>
    %8 = arith.mulf %7, %7 : vector<16x32xf32>
    %cst_2 = arith.constant dense<0.000000e+00> : vector<16xf32>
    %9 = vector.multi_reduction <add>, %8, %cst_2 [1] : vector<16x32xf32> to vector<16xf32>
    %10 = vector.shape_cast %9 : vector<16xf32> to vector<16x1xf32>
    %cst_3 = arith.constant 3.200000e+01 : f32
    %11 = vector.broadcast %cst_3 : f32 to vector<16x1xf32>
    %12 = arith.divf %10, %11 : vector<16x1xf32>
    %cst_4 = arith.constant 9.99999996E-13 : f32
    %13 = vector.broadcast %cst_4 : f32 to vector<16x1xf32>
    %14 = arith.addf %12, %13 : vector<16x1xf32>
    %15 = math.rsqrt %14 : vector<16x1xf32>
    %16 = vector.broadcast %5 : vector<16x1xf32> to vector<16x32xf32>
    %17 = arith.subf %1, %16 : vector<16x32xf32>
    %18 = vector.broadcast %15 : vector<16x1xf32> to vector<16x32xf32>
    %19 = arith.mulf %17, %18 : vector<16x32xf32>
    %c0_5 = arith.constant 0 : index
    %c0_6 = arith.constant 0 : index
    %20 = vector.load %arg2[%c0_5, %c0_6] : memref<1x32xf32, #tpu.memory_space<vmem>>, vector<1x32xf32>
    %21 = vector.broadcast %20 : vector<1x32xf32> to vector<16x32xf32>
    %22 = arith.mulf %19, %21 : vector<16x32xf32>
    %c0_7 = arith.constant 0 : index
    %c0_8 = arith.constant 0 : index
    %23 = vector.load %arg3[%c0_7, %c0_8] : memref<1x32xf32, #tpu.memory_space<vmem>>, vector<1x32xf32>
    %24 = vector.broadcast %23 : vector<1x32xf32> to vector<16x32xf32>
    %25 = arith.addf %22, %24 : vector<16x32xf32>
    %26 = arith.truncf %25 : vector<16x32xf32> to vector<16x32xbf16>
    %c0_9 = arith.constant 0 : index
    %c0_10 = arith.constant 0 : index
    %27 = vector.load %arg4[%c0_9, %c0_10] : memref<16x32xbf16, #tpu.memory_space<vmem>>, vector<16x32xbf16>
    tpu.vector_store %arg4[%c0_9, %c0_10], %26 {strides = array<i32>} : memref<16x32xbf16, #tpu.memory_space<vmem>>, vector<16x32xbf16>,
    return
  }
  func.func @transform_0(%arg0: i32) -> (i32, i32) {
    %c0_i32 = arith.constant 0 : i32
    %c0_i32_0 = arith.constant 0 : i32
    return %arg0, %c0_i32 : i32, i32
  }
  func.func @transform_1(%arg0: i32) -> (i32, i32) {
    %c0_i32 = arith.constant 0 : i32
    %c0_i32_0 = arith.constant 0 : i32
    %c0_i32_1 = arith.constant 0 : i32
    return %c0_i32, %c0_i32_0 : i32, i32
  }
  func.func @transform_2(%arg0: i32) -> (i32, i32) {
    %c0_i32 = arith.constant 0 : i32
    %c0_i32_0 = arith.constant 0 : i32
    %c0_i32_1 = arith.constant 0 : i32
    return %c0_i32, %c0_i32_0 : i32, i32
  }
  func.func @transform_3(%arg0: i32) -> (i32, i32) {
    %c0_i32 = arith.constant 0 : i32
    %c0_i32_0 = arith.constant 0 : i32
    return %arg0, %c0_i32 : i32, i32
  }
}

module attributes {stable_mosaic.version = 11 : i64} {
  func.func @_linear_ln_kernel(%arg0: i32, %arg1: i32, %arg2: memref<16x32xbf16, #tpu.memory_space<vmem>>, %arg3: memref<32x32xbf16, #tpu.memory_space<vmem>>, %arg4: memref<1x32xf32, #tpu.memory_space<vmem>>, %arg5: memref<16x32xbf16, #tpu.memory_space<vmem>>, %arg6: memref<1x32xf32, #tpu.memory_space<vmem>>, %arg7: memref<1x32xf32, #tpu.memory_space<vmem>>, %arg8: memref<16x32xbf16, #tpu.memory_space<vmem>>, %arg9: memref<16x32xf32, #tpu.memory_space<vmem>>) attributes {dimension_semantics = [#tpu.dimension_semantics<parallel>, #tpu.dimension_semantics<arbitrary>], iteration_bounds = array<i64: 1, 1>, scalar_prefetch = 0 : i64, scratch_operands = 1 : i64, tpu.core_type = #tpu.core_type<tc>, window_params = [{transform_indices = @transform_0, window_bounds = array<i64: 16, 32>}, {transform_indices = @transform_1, window_bounds = array<i64: 32, 32>}, {pipeline_mode = #tpu.pipeline_mode<synchronous>, transform_indices = @transform_2, window_bounds = array<i64: 1, 32>}, {transform_indices = @transform_3, window_bounds = array<i64: 16, 32>}, {pipeline_mode = #tpu.pipeline_mode<synchronous>, transform_indices = @transform_4, window_bounds = array<i64: 1, 32>}, {pipeline_mode = #tpu.pipeline_mode<synchronous>, transform_indices = @transform_5, window_bounds = array<i64: 1, 32>}, {transform_indices = @transform_6, window_bounds = array<i64: 16, 32>}]} {
    %c0_i32 = arith.constant 0 : i32
    %0 = arith.cmpi eq, %arg1, %c0_i32 : i32
    %1 = arith.extui %0 : i1 to i32
    %c0_i32_0 = arith.constant 0 : i32
    %2 = arith.cmpi ne, %1, %c0_i32_0 : i32
    scf.if %2 {
      %cst_10 = arith.constant 0.000000e+00 : f32
      %12 = vector.broadcast %cst_10 : f32 to vector<16x32xf32>
      %c0_11 = arith.constant 0 : index
      %c0_12 = arith.constant 0 : index
      %13 = vector.load %arg9[%c0_11, %c0_12] : memref<16x32xf32, #tpu.memory_space<vmem>>, vector<16x32xf32>
      tpu.vector_store %arg9[%c0_11, %c0_12], %12 {strides = array<i32>} : memref<16x32xf32, #tpu.memory_space<vmem>>, vector<16x32xf32>,
    } else {
    }
    %c0 = arith.constant 0 : index
    %c0_1 = arith.constant 0 : index
    %3 = vector.load %arg9[%c0, %c0_1] : memref<16x32xf32, #tpu.memory_space<vmem>>, vector<16x32xf32>
    %c0_2 = arith.constant 0 : index
    %c0_3 = arith.constant 0 : index
    %4 = vector.load %arg2[%c0_2, %c0_3] : memref<16x32xbf16, #tpu.memory_space<vmem>>, vector<16x32xbf16>
    %c0_4 = arith.constant 0 : index
    %c0_5 = arith.constant 0 : index
    %5 = vector.load %arg3[%c0_4, %c0_5] : memref<32x32xbf16, #tpu.memory_space<vmem>>, vector<32x32xbf16>
    %cst = arith.constant dense<0.000000e+00> : vector<16x32xf32>
    %6 = tpu.matmul %4, %5, %cst {dimension_numbers = #tpu.dot_dimension_numbers<[1], [0], [0], [1], [0, 0, 1, 1], [], []>} : vector<16x32xbf16>, vector<32x32xbf16>, vector<16x32xf32> -> vector<16x32xf32>
    %7 = arith.addf %3, %6 : vector<16x32xf32>
    %c0_6 = arith.constant 0 : index
    %c0_7 = arith.constant 0 : index
    %8 = vector.load %arg9[%c0_6, %c0_7] : memref<16x32xf32, #tpu.memory_space<vmem>>, vector<16x32xf32>
    tpu.vector_store %arg9[%c0_6, %c0_7], %7 {strides = array<i32>} : memref<16x32xf32, #tpu.memory_space<vmem>>, vector<16x32xf32>,
    %c0_i32_8 = arith.constant 0 : i32
    %9 = arith.cmpi eq, %arg1, %c0_i32_8 : i32
    %10 = arith.extui %9 : i1 to i32
    %c0_i32_9 = arith.constant 0 : i32
    %11 = arith.cmpi ne, %10, %c0_i32_9 : i32
    scf.if %11 {
      %c0_10 = arith.constant 0 : index
      %c0_11 = arith.constant 0 : index
      %12 = vector.load %arg9[%c0_10, %c0_11] : memref<16x32xf32, #tpu.memory_space<vmem>>, vector<16x32xf32>
      %c0_12 = arith.constant 0 : index
      %c0_13 = arith.constant 0 : index
      %13 = vector.load %arg4[%c0_12, %c0_13] : memref<1x32xf32, #tpu.memory_space<vmem>>, vector<1x32xf32>
      %14 = vector.broadcast %13 : vector<1x32xf32> to vector<16x32xf32>
      %15 = arith.addf %12, %14 : vector<16x32xf32>
      %c0_14 = arith.constant 0 : index
      %c0_15 = arith.constant 0 : index
      %16 = vector.load %arg5[%c0_14, %c0_15] : memref<16x32xbf16, #tpu.memory_space<vmem>>, vector<16x32xbf16>
      %17 = arith.extf %16 : vector<16x32xbf16> to vector<16x32xf32>
      %18 = arith.addf %15, %17 : vector<16x32xf32>
      %cst_16 = arith.constant dense<0.000000e+00> : vector<16xf32>
      %19 = vector.multi_reduction <add>, %18, %cst_16 [1] : vector<16x32xf32> to vector<16xf32>
      %20 = vector.shape_cast %19 : vector<16xf32> to vector<16x1xf32>
      %cst_17 = arith.constant 3.200000e+01 : f32
      %21 = vector.broadcast %cst_17 : f32 to vector<16x1xf32>
      %22 = arith.divf %20, %21 : vector<16x1xf32>
      %23 = vector.broadcast %22 : vector<16x1xf32> to vector<16x32xf32>
      %24 = arith.subf %18, %23 : vector<16x32xf32>
      %25 = arith.mulf %24, %24 : vector<16x32xf32>
      %cst_18 = arith.constant dense<0.000000e+00> : vector<16xf32>
      %26 = vector.multi_reduction <add>, %25, %cst_18 [1] : vector<16x32xf32> to vector<16xf32>
      %27 = vector.shape_cast %26 : vector<16xf32> to vector<16x1xf32>
      %cst_19 = arith.constant 3.200000e+01 : f32
      %28 = vector.broadcast %cst_19 : f32 to vector<16x1xf32>
      %29 = arith.divf %27, %28 : vector<16x1xf32>
      %cst_20 = arith.constant 9.99999996E-13 : f32
      %30 = vector.broadcast %cst_20 : f32 to vector<16x1xf32>
      %31 = arith.addf %29, %30 : vector<16x1xf32>
      %32 = math.rsqrt %31 : vector<16x1xf32>
      %33 = vector.broadcast %22 : vector<16x1xf32> to vector<16x32xf32>
      %34 = arith.subf %18, %33 : vector<16x32xf32>
      %35 = vector.broadcast %32 : vector<16x1xf32> to vector<16x32xf32>
      %36 = arith.mulf %34, %35 : vector<16x32xf32>
      %c0_21 = arith.constant 0 : index
      %c0_22 = arith.constant 0 : index
      %37 = vector.load %arg6[%c0_21, %c0_22] : memref<1x32xf32, #tpu.memory_space<vmem>>, vector<1x32xf32>
      %38 = vector.broadcast %37 : vector<1x32xf32> to vector<16x32xf32>
      %39 = arith.mulf %36, %38 : vector<16x32xf32>
      %c0_23 = arith.constant 0 : index
      %c0_24 = arith.constant 0 : index
      %40 = vector.load %arg7[%c0_23, %c0_24] : memref<1x32xf32, #tpu.memory_space<vmem>>, vector<1x32xf32>
      %41 = vector.broadcast %40 : vector<1x32xf32> to vector<16x32xf32>
      %42 = arith.addf %39, %41 : vector<16x32xf32>
      %43 = arith.truncf %42 : vector<16x32xf32> to vector<16x32xbf16>
      %c0_25 = arith.constant 0 : index
      %c0_26 = arith.constant 0 : index
      %44 = vector.load %arg8[%c0_25, %c0_26] : memref<16x32xbf16, #tpu.memory_space<vmem>>, vector<16x32xbf16>
      tpu.vector_store %arg8[%c0_25, %c0_26], %43 {strides = array<i32>} : memref<16x32xbf16, #tpu.memory_space<vmem>>, vector<16x32xbf16>,
    } else {
    }
    return
  }
  func.func @transform_0(%arg0: i32, %arg1: i32) -> (i32, i32) {
    %c0_i32 = arith.constant 0 : i32
    return %arg0, %arg1 : i32, i32
  }
  func.func @transform_1(%arg0: i32, %arg1: i32) -> (i32, i32) {
    %c0_i32 = arith.constant 0 : i32
    %c0_i32_0 = arith.constant 0 : i32
    return %arg1, %c0_i32 : i32, i32
  }
  func.func @transform_2(%arg0: i32, %arg1: i32) -> (i32, i32) {
    %c0_i32 = arith.constant 0 : i32
    %c0_i32_0 = arith.constant 0 : i32
    %c0_i32_1 = arith.constant 0 : i32
    return %c0_i32, %c0_i32_0 : i32, i32
  }
  func.func @transform_3(%arg0: i32, %arg1: i32) -> (i32, i32) {
    %c0_i32 = arith.constant 0 : i32
    %c0_i32_0 = arith.constant 0 : i32
    return %arg0, %c0_i32 : i32, i32
  }
  func.func @transform_4(%arg0: i32, %arg1: i32) -> (i32, i32) {
    %c0_i32 = arith.constant 0 : i32
    %c0_i32_0 = arith.constant 0 : i32
    %c0_i32_1 = arith.constant 0 : i32
    return %c0_i32, %c0_i32_0 : i32, i32
  }
  func.func @transform_5(%arg0: i32, %arg1: i32) -> (i32, i32) {
    %c0_i32 = arith.constant 0 : i32
    %c0_i32_0 = arith.constant 0 : i32
    %c0_i32_1 = arith.constant 0 : i32
    return %c0_i32, %c0_i32_0 : i32, i32
  }
  func.func @transform_6(%arg0: i32, %arg1: i32) -> (i32, i32) {
    %c0_i32 = arith.constant 0 : i32
    %c0_i32_0 = arith.constant 0 : i32
    return %arg0, %c0_i32 : i32, i32
  }
}

module attributes {stable_mosaic.version = 11 : i64} {
  func.func @_linear_kernel(%arg0: i32, %arg1: i32, %arg2: i32, %arg3: memref<16x32xbf16, #tpu.memory_space<vmem>>, %arg4: memref<32x64xbf16, #tpu.memory_space<vmem>>, %arg5: memref<1x64xf32, #tpu.memory_space<vmem>>, %arg6: memref<16x64xbf16, #tpu.memory_space<vmem>>, %arg7: memref<16x64xf32, #tpu.memory_space<vmem>>) attributes {dimension_semantics = [#tpu.dimension_semantics<parallel>, #tpu.dimension_semantics<parallel>, #tpu.dimension_semantics<arbitrary>], iteration_bounds = array<i64: 1, 1, 1>, scalar_prefetch = 0 : i64, scratch_operands = 1 : i64, tpu.core_type = #tpu.core_type<tc>, window_params = [{transform_indices = @transform_0, window_bounds = array<i64: 16, 32>}, {transform_indices = @transform_1, window_bounds = array<i64: 32, 64>}, {transform_indices = @transform_2, window_bounds = array<i64: 1, 64>}, {transform_indices = @transform_3, window_bounds = array<i64: 16, 64>}]} {
    %c0_i32 = arith.constant 0 : i32
    %0 = arith.cmpi eq, %arg2, %c0_i32 : i32
    %1 = arith.extui %0 : i1 to i32
    %c0_i32_0 = arith.constant 0 : i32
    %2 = arith.cmpi ne, %1, %c0_i32_0 : i32
    scf.if %2 {
      %cst_10 = arith.constant 0.000000e+00 : f32
      %12 = vector.broadcast %cst_10 : f32 to vector<16x64xf32>
      %c0_11 = arith.constant 0 : index
      %c0_12 = arith.constant 0 : index
      %13 = vector.load %arg7[%c0_11, %c0_12] : memref<16x64xf32, #tpu.memory_space<vmem>>, vector<16x64xf32>
      tpu.vector_store %arg7[%c0_11, %c0_12], %12 {strides = array<i32>} : memref<16x64xf32, #tpu.memory_space<vmem>>, vector<16x64xf32>,
    } else {
    }
    %c0 = arith.constant 0 : index
    %c0_1 = arith.constant 0 : index
    %3 = vector.load %arg7[%c0, %c0_1] : memref<16x64xf32, #tpu.memory_space<vmem>>, vector<16x64xf32>
    %c0_2 = arith.constant 0 : index
    %c0_3 = arith.constant 0 : index
    %4 = vector.load %arg3[%c0_2, %c0_3] : memref<16x32xbf16, #tpu.memory_space<vmem>>, vector<16x32xbf16>
    %c0_4 = arith.constant 0 : index
    %c0_5 = arith.constant 0 : index
    %5 = vector.load %arg4[%c0_4, %c0_5] : memref<32x64xbf16, #tpu.memory_space<vmem>>, vector<32x64xbf16>
    %cst = arith.constant dense<0.000000e+00> : vector<16x64xf32>
    %6 = tpu.matmul %4, %5, %cst {dimension_numbers = #tpu.dot_dimension_numbers<[1], [0], [0], [1], [0, 0, 1, 1], [], []>} : vector<16x32xbf16>, vector<32x64xbf16>, vector<16x64xf32> -> vector<16x64xf32>
    %7 = arith.addf %3, %6 : vector<16x64xf32>
    %c0_6 = arith.constant 0 : index
    %c0_7 = arith.constant 0 : index
    %8 = vector.load %arg7[%c0_6, %c0_7] : memref<16x64xf32, #tpu.memory_space<vmem>>, vector<16x64xf32>
    tpu.vector_store %arg7[%c0_6, %c0_7], %7 {strides = array<i32>} : memref<16x64xf32, #tpu.memory_space<vmem>>, vector<16x64xf32>,
    %c0_i32_8 = arith.constant 0 : i32
    %9 = arith.cmpi eq, %arg2, %c0_i32_8 : i32
    %10 = arith.extui %9 : i1 to i32
    %c0_i32_9 = arith.constant 0 : i32
    %11 = arith.cmpi ne, %10, %c0_i32_9 : i32
    scf.if %11 {
      %c0_10 = arith.constant 0 : index
      %c0_11 = arith.constant 0 : index
      %12 = vector.load %arg7[%c0_10, %c0_11] : memref<16x64xf32, #tpu.memory_space<vmem>>, vector<16x64xf32>
      %c0_12 = arith.constant 0 : index
      %c0_13 = arith.constant 0 : index
      %13 = vector.load %arg5[%c0_12, %c0_13] : memref<1x64xf32, #tpu.memory_space<vmem>>, vector<1x64xf32>
      %14 = vector.broadcast %13 : vector<1x64xf32> to vector<16x64xf32>
      %15 = arith.addf %12, %14 : vector<16x64xf32>
      %cst_14 = arith.constant 5.000000e-01 : f32
      %16 = vector.broadcast %cst_14 : f32 to vector<16x64xf32>
      %17 = arith.mulf %16, %15 : vector<16x64xf32>
      %cst_15 = arith.constant 4.471500e-02 : f32
      %18 = vector.broadcast %cst_15 : f32 to vector<16x64xf32>
      %19 = arith.mulf %18, %15 : vector<16x64xf32>
      %20 = arith.mulf %19, %15 : vector<16x64xf32>
      %21 = arith.mulf %20, %15 : vector<16x64xf32>
      %22 = arith.addf %15, %21 : vector<16x64xf32>
      %cst_16 = arith.constant 0.797884583 : f32
      %23 = vector.broadcast %cst_16 : f32 to vector<16x64xf32>
      %24 = arith.mulf %23, %22 : vector<16x64xf32>
      %25 = math.tanh %24 : vector<16x64xf32>
      %cst_17 = arith.constant 1.000000e+00 : f32
      %26 = vector.broadcast %cst_17 : f32 to vector<16x64xf32>
      %27 = arith.addf %26, %25 : vector<16x64xf32>
      %28 = arith.mulf %17, %27 : vector<16x64xf32>
      %29 = arith.truncf %28 : vector<16x64xf32> to vector<16x64xbf16>
      %c0_18 = arith.constant 0 : index
      %c0_19 = arith.constant 0 : index
      %30 = vector.load %arg6[%c0_18, %c0_19] : memref<16x64xbf16, #tpu.memory_space<vmem>>, vector<16x64xbf16>
      tpu.vector_store %arg6[%c0_18, %c0_19], %29 {strides = array<i32>} : memref<16x64xbf16, #tpu.memory_space<vmem>>, vector<16x64xbf16>,
    } else {
    }
    return
  }
  func.func @transform_0(%arg0: i32, %arg1: i32, %arg2: i32) -> (i32, i32) {
    %c0_i32 = arith.constant 0 : i32
    return %arg0, %arg2 : i32, i32
  }
  func.func @transform_1(%arg0: i32, %arg1: i32, %arg2: i32) -> (i32, i32) {
    %c0_i32 = arith.constant 0 : i32
    return %arg2, %arg1 : i32, i32
  }
  func.func @transform_2(%arg0: i32, %arg1: i32, %arg2: i32) -> (i32, i32) {
    %c0_i32 = arith.constant 0 : i32
    %c0_i32_0 = arith.constant 0 : i32
    return %c0_i32, %arg1 : i32, i32
  }
  func.func @transform_3(%arg0: i32, %arg1: i32, %arg2: i32) -> (i32, i32) {
    %c0_i32 = arith.constant 0 : i32
    return %arg0, %arg1 : i32, i32
  }
}

module attributes {stable_mosaic.version = 11 : i64} {
  func.func @_linear_ln_kernel(%arg0: i32, %arg1: i32, %arg2: memref<16x64xbf16, #tpu.memory_space<vmem>>, %arg3: memref<64x32xbf16, #tpu.memory_space<vmem>>, %arg4: memref<1x32xf32, #tpu.memory_space<vmem>>, %arg5: memref<16x32xbf16, #tpu.memory_space<vmem>>, %arg6: memref<1x32xf32, #tpu.memory_space<vmem>>, %arg7: memref<1x32xf32, #tpu.memory_space<vmem>>, %arg8: memref<16x32xbf16, #tpu.memory_space<vmem>>, %arg9: memref<16x32xf32, #tpu.memory_space<vmem>>) attributes {dimension_semantics = [#tpu.dimension_semantics<parallel>, #tpu.dimension_semantics<arbitrary>], iteration_bounds = array<i64: 1, 1>, scalar_prefetch = 0 : i64, scratch_operands = 1 : i64, tpu.core_type = #tpu.core_type<tc>, window_params = [{transform_indices = @transform_0, window_bounds = array<i64: 16, 64>}, {transform_indices = @transform_1, window_bounds = array<i64: 64, 32>}, {pipeline_mode = #tpu.pipeline_mode<synchronous>, transform_indices = @transform_2, window_bounds = array<i64: 1, 32>}, {transform_indices = @transform_3, window_bounds = array<i64: 16, 32>}, {pipeline_mode = #tpu.pipeline_mode<synchronous>, transform_indices = @transform_4, window_bounds = array<i64: 1, 32>}, {pipeline_mode = #tpu.pipeline_mode<synchronous>, transform_indices = @transform_5, window_bounds = array<i64: 1, 32>}, {transform_indices = @transform_6, window_bounds = array<i64: 16, 32>}]} {
    %c0_i32 = arith.constant 0 : i32
    %0 = arith.cmpi eq, %arg1, %c0_i32 : i32
    %1 = arith.extui %0 : i1 to i32
    %c0_i32_0 = arith.constant 0 : i32
    %2 = arith.cmpi ne, %1, %c0_i32_0 : i32
    scf.if %2 {
      %cst_10 = arith.constant 0.000000e+00 : f32
      %12 = vector.broadcast %cst_10 : f32 to vector<16x32xf32>
      %c0_11 = arith.constant 0 : index
      %c0_12 = arith.constant 0 : index
      %13 = vector.load %arg9[%c0_11, %c0_12] : memref<16x32xf32, #tpu.memory_space<vmem>>, vector<16x32xf32>
      tpu.vector_store %arg9[%c0_11, %c0_12], %12 {strides = array<i32>} : memref<16x32xf32, #tpu.memory_space<vmem>>, vector<16x32xf32>,
    } else {
    }
    %c0 = arith.constant 0 : index
    %c0_1 = arith.constant 0 : index
    %3 = vector.load %arg9[%c0, %c0_1] : memref<16x32xf32, #tpu.memory_space<vmem>>, vector<16x32xf32>
    %c0_2 = arith.constant 0 : index
    %c0_3 = arith.constant 0 : index
    %4 = vector.load %arg2[%c0_2, %c0_3] : memref<16x64xbf16, #tpu.memory_space<vmem>>, vector<16x64xbf16>
    %c0_4 = arith.constant 0 : index
    %c0_5 = arith.constant 0 : index
    %5 = vector.load %arg3[%c0_4, %c0_5] : memref<64x32xbf16, #tpu.memory_space<vmem>>, vector<64x32xbf16>
    %cst = arith.constant dense<0.000000e+00> : vector<16x32xf32>
    %6 = tpu.matmul %4, %5, %cst {dimension_numbers = #tpu.dot_dimension_numbers<[1], [0], [0], [1], [0, 0, 1, 1], [], []>} : vector<16x64xbf16>, vector<64x32xbf16>, vector<16x32xf32> -> vector<16x32xf32>
    %7 = arith.addf %3, %6 : vector<16x32xf32>
    %c0_6 = arith.constant 0 : index
    %c0_7 = arith.constant 0 : index
    %8 = vector.load %arg9[%c0_6, %c0_7] : memref<16x32xf32, #tpu.memory_space<vmem>>, vector<16x32xf32>
    tpu.vector_store %arg9[%c0_6, %c0_7], %7 {strides = array<i32>} : memref<16x32xf32, #tpu.memory_space<vmem>>, vector<16x32xf32>,
    %c0_i32_8 = arith.constant 0 : i32
    %9 = arith.cmpi eq, %arg1, %c0_i32_8 : i32
    %10 = arith.extui %9 : i1 to i32
    %c0_i32_9 = arith.constant 0 : i32
    %11 = arith.cmpi ne, %10, %c0_i32_9 : i32
    scf.if %11 {
      %c0_10 = arith.constant 0 : index
      %c0_11 = arith.constant 0 : index
      %12 = vector.load %arg9[%c0_10, %c0_11] : memref<16x32xf32, #tpu.memory_space<vmem>>, vector<16x32xf32>
      %c0_12 = arith.constant 0 : index
      %c0_13 = arith.constant 0 : index
      %13 = vector.load %arg4[%c0_12, %c0_13] : memref<1x32xf32, #tpu.memory_space<vmem>>, vector<1x32xf32>
      %14 = vector.broadcast %13 : vector<1x32xf32> to vector<16x32xf32>
      %15 = arith.addf %12, %14 : vector<16x32xf32>
      %c0_14 = arith.constant 0 : index
      %c0_15 = arith.constant 0 : index
      %16 = vector.load %arg5[%c0_14, %c0_15] : memref<16x32xbf16, #tpu.memory_space<vmem>>, vector<16x32xbf16>
      %17 = arith.extf %16 : vector<16x32xbf16> to vector<16x32xf32>
      %18 = arith.addf %15, %17 : vector<16x32xf32>
      %cst_16 = arith.constant dense<0.000000e+00> : vector<16xf32>
      %19 = vector.multi_reduction <add>, %18, %cst_16 [1] : vector<16x32xf32> to vector<16xf32>
      %20 = vector.shape_cast %19 : vector<16xf32> to vector<16x1xf32>
      %cst_17 = arith.constant 3.200000e+01 : f32
      %21 = vector.broadcast %cst_17 : f32 to vector<16x1xf32>
      %22 = arith.divf %20, %21 : vector<16x1xf32>
      %23 = vector.broadcast %22 : vector<16x1xf32> to vector<16x32xf32>
      %24 = arith.subf %18, %23 : vector<16x32xf32>
      %25 = arith.mulf %24, %24 : vector<16x32xf32>
      %cst_18 = arith.constant dense<0.000000e+00> : vector<16xf32>
      %26 = vector.multi_reduction <add>, %25, %cst_18 [1] : vector<16x32xf32> to vector<16xf32>
      %27 = vector.shape_cast %26 : vector<16xf32> to vector<16x1xf32>
      %cst_19 = arith.constant 3.200000e+01 : f32
      %28 = vector.broadcast %cst_19 : f32 to vector<16x1xf32>
      %29 = arith.divf %27, %28 : vector<16x1xf32>
      %cst_20 = arith.constant 9.99999996E-13 : f32
      %30 = vector.broadcast %cst_20 : f32 to vector<16x1xf32>
      %31 = arith.addf %29, %30 : vector<16x1xf32>
      %32 = math.rsqrt %31 : vector<16x1xf32>
      %33 = vector.broadcast %22 : vector<16x1xf32> to vector<16x32xf32>
      %34 = arith.subf %18, %33 : vector<16x32xf32>
      %35 = vector.broadcast %32 : vector<16x1xf32> to vector<16x32xf32>
      %36 = arith.mulf %34, %35 : vector<16x32xf32>
      %c0_21 = arith.constant 0 : index
      %c0_22 = arith.constant 0 : index
      %37 = vector.load %arg6[%c0_21, %c0_22] : memref<1x32xf32, #tpu.memory_space<vmem>>, vector<1x32xf32>
      %38 = vector.broadcast %37 : vector<1x32xf32> to vector<16x32xf32>
      %39 = arith.mulf %36, %38 : vector<16x32xf32>
      %c0_23 = arith.constant 0 : index
      %c0_24 = arith.constant 0 : index
      %40 = vector.load %arg7[%c0_23, %c0_24] : memref<1x32xf32, #tpu.memory_space<vmem>>, vector<1x32xf32>
      %41 = vector.broadcast %40 : vector<1x32xf32> to vector<16x32xf32>
      %42 = arith.addf %39, %41 : vector<16x32xf32>
      %43 = arith.truncf %42 : vector<16x32xf32> to vector<16x32xbf16>
      %c0_25 = arith.constant 0 : index
      %c0_26 = arith.constant 0 : index
      %44 = vector.load %arg8[%c0_25, %c0_26] : memref<16x32xbf16, #tpu.memory_space<vmem>>, vector<16x32xbf16>
      tpu.vector_store %arg8[%c0_25, %c0_26], %43 {strides = array<i32>} : memref<16x32xbf16, #tpu.memory_space<vmem>>, vector<16x32xbf16>,
    } else {
    }
    return
  }
  func.func @transform_0(%arg0: i32, %arg1: i32) -> (i32, i32) {
    %c0_i32 = arith.constant 0 : i32
    return %arg0, %arg1 : i32, i32
  }
  func.func @transform_1(%arg0: i32, %arg1: i32) -> (i32, i32) {
    %c0_i32 = arith.constant 0 : i32
    %c0_i32_0 = arith.constant 0 : i32
    return %arg1, %c0_i32 : i32, i32
  }
  func.func @transform_2(%arg0: i32, %arg1: i32) -> (i32, i32) {
    %c0_i32 = arith.constant 0 : i32
    %c0_i32_0 = arith.constant 0 : i32
    %c0_i32_1 = arith.constant 0 : i32
    return %c0_i32, %c0_i32_0 : i32, i32
  }
  func.func @transform_3(%arg0: i32, %arg1: i32) -> (i32, i32) {
    %c0_i32 = arith.constant 0 : i32
    %c0_i32_0 = arith.constant 0 : i32
    return %arg0, %c0_i32 : i32, i32
  }
  func.func @transform_4(%arg0: i32, %arg1: i32) -> (i32, i32) {
    %c0_i32 = arith.constant 0 : i32
    %c0_i32_0 = arith.constant 0 : i32
    %c0_i32_1 = arith.constant 0 : i32
    return %c0_i32, %c0_i32_0 : i32, i32
  }
  func.func @transform_5(%arg0: i32, %arg1: i32) -> (i32, i32) {
    %c0_i32 = arith.constant 0 : i32
    %c0_i32_0 = arith.constant 0 : i32
    %c0_i32_1 = arith.constant 0 : i32
    return %c0_i32, %c0_i32_0 : i32, i32
  }
  func.func @transform_6(%arg0: i32, %arg1: i32) -> (i32, i32) {
    %c0_i32 = arith.constant 0 : i32
    %c0_i32_0 = arith.constant 0 : i32
    return %arg0, %c0_i32 : i32, i32
  }
}

module attributes {stable_mosaic.version = 11 : i64} {
  func.func @_classifier_kernel(%arg0: i32, %arg1: memref<2x64xbf16, #tpu.memory_space<vmem>>, %arg2: memref<64x5xf32, #tpu.memory_space<vmem>>, %arg3: memref<1x5xf32, #tpu.memory_space<vmem>>, %arg4: memref<2x1xi32, #tpu.memory_space<vmem>>, %arg5: memref<1x1xf32, #tpu.memory_space<vmem>>, %arg6: memref<2x1xi32, #tpu.memory_space<vmem>>) attributes {dimension_semantics = [#tpu.dimension_semantics<arbitrary>], iteration_bounds = array<i64: 1>, scalar_prefetch = 0 : i64, scratch_operands = 0 : i64, tpu.core_type = #tpu.core_type<tc>, window_params = [{pipeline_mode = #tpu.pipeline_mode<synchronous>, transform_indices = @transform_0, window_bounds = array<i64: 2, 64>}, {pipeline_mode = #tpu.pipeline_mode<synchronous>, transform_indices = @transform_1, window_bounds = array<i64: 64, 5>}, {pipeline_mode = #tpu.pipeline_mode<synchronous>, transform_indices = @transform_2, window_bounds = array<i64: 1, 5>}, {pipeline_mode = #tpu.pipeline_mode<synchronous>, transform_indices = @transform_3, window_bounds = array<i64: 2, 1>}, {pipeline_mode = #tpu.pipeline_mode<synchronous>, transform_indices = @transform_4, window_bounds = array<i64: 1, 1>}, {pipeline_mode = #tpu.pipeline_mode<synchronous>, transform_indices = @transform_5, window_bounds = array<i64: 2, 1>}]} {
    %c0 = arith.constant 0 : index
    %c0_0 = arith.constant 0 : index
    %0 = vector.load %arg1[%c0, %c0_0] : memref<2x64xbf16, #tpu.memory_space<vmem>>, vector<2x64xbf16>
    %1 = arith.extf %0 : vector<2x64xbf16> to vector<2x64xf32>
    %c0_1 = arith.constant 0 : index
    %c0_2 = arith.constant 0 : index
    %2 = vector.load %arg2[%c0_1, %c0_2] : memref<64x5xf32, #tpu.memory_space<vmem>>, vector<64x5xf32>
    %cst = arith.constant dense<0.000000e+00> : vector<2x5xf32>
    %3 = tpu.matmul %1, %2, %cst {dimension_numbers = #tpu.dot_dimension_numbers<[1], [0], [0], [1], [0, 0, 1, 1], [], []>} : vector<2x64xf32>, vector<64x5xf32>, vector<2x5xf32> -> vector<2x5xf32>
    %c0_3 = arith.constant 0 : index
    %c0_4 = arith.constant 0 : index
    %4 = vector.load %arg3[%c0_3, %c0_4] : memref<1x5xf32, #tpu.memory_space<vmem>>, vector<1x5xf32>
    %5 = vector.broadcast %4 : vector<1x5xf32> to vector<2x5xf32>
    %6 = arith.addf %3, %5 : vector<2x5xf32>
    %7 = tpu.iota {dimensions = array<i32: 1>} : vector<2x5xi32>
    %cst_5 = arith.constant dense<0xFF800000> : vector<2xf32>
    %8 = vector.multi_reduction <maximumf>, %6, %cst_5 [1] : vector<2x5xf32> to vector<2xf32>
    %9 = vector.shape_cast %8 : vector<2xf32> to vector<2x1xf32>
    %10 = vector.broadcast %9 : vector<2x1xf32> to vector<2x5xf32>
    %11 = arith.cmpf oeq, %6, %10 : vector<2x5xf32>
    %c5_i32 = arith.constant 5 : i32
    %12 = vector.broadcast %c5_i32 : i32 to vector<2x5xi32>
    %13 = arith.select %11, %7, %12 : vector<2x5xi1>, vector<2x5xi32>
    %cst_6 = arith.constant dense<2147483647> : vector<2xi32>
    %14 = vector.multi_reduction <minsi>, %13, %cst_6 [1] : vector<2x5xi32> to vector<2xi32>
    %15 = vector.shape_cast %14 : vector<2xi32> to vector<2x1xi32>
    %c0_7 = arith.constant 0 : index
    %c0_8 = arith.constant 0 : index
    %16 = vector.load %arg6[%c0_7, %c0_8] : memref<2x1xi32, #tpu.memory_space<vmem>>, vector<2x1xi32>
    tpu.vector_store %arg6[%c0_7, %c0_8], %15 {strides = array<i32>} : memref<2x1xi32, #tpu.memory_space<vmem>>, vector<2x1xi32>,
    %c0_9 = arith.constant 0 : index
    %c0_10 = arith.constant 0 : index
    %17 = vector.load %arg4[%c0_9, %c0_10] : memref<2x1xi32, #tpu.memory_space<vmem>>, vector<2x1xi32>
    %18 = vector.broadcast %9 : vector<2x1xf32> to vector<2x5xf32>
    %19 = arith.subf %6, %18 : vector<2x5xf32>
    %20 = math.exp %19 : vector<2x5xf32>
    %cst_11 = arith.constant dense<0.000000e+00> : vector<2xf32>
    %21 = vector.multi_reduction <add>, %20, %cst_11 [1] : vector<2x5xf32> to vector<2xf32>
    %22 = vector.shape_cast %21 : vector<2xf32> to vector<2x1xf32>
    %23 = math.log %22 : vector<2x1xf32>
    %24 = arith.addf %23, %9 : vector<2x1xf32>
    %25 = vector.broadcast %17 : vector<2x1xi32> to vector<2x5xi32>
    %26 = arith.cmpi eq, %7, %25 : vector<2x5xi32>
    %cst_12 = arith.constant 0.000000e+00 : f32
    %27 = vector.broadcast %cst_12 : f32 to vector<2x5xf32>
    %28 = arith.select %26, %6, %27 : vector<2x5xi1>, vector<2x5xf32>
    %cst_13 = arith.constant dense<0.000000e+00> : vector<2xf32>
    %29 = vector.multi_reduction <add>, %28, %cst_13 [1] : vector<2x5xf32> to vector<2xf32>
    %30 = vector.shape_cast %29 : vector<2xf32> to vector<2x1xf32>
    %31 = arith.subf %24, %30 : vector<2x1xf32>
    %cst_14 = arith.constant dense<0.000000e+00> : vector<1xf32>
    %32 = vector.multi_reduction <add>, %31, %cst_14 [0] : vector<2x1xf32> to vector<1xf32>
    %33 = vector.shape_cast %32 : vector<1xf32> to vector<1x1xf32>
    %cst_15 = arith.constant 2.000000e+00 : f32
    %34 = vector.broadcast %cst_15 : f32 to vector<1x1xf32>
    %35 = arith.divf %33, %34 : vector<1x1xf32>
    %c0_16 = arith.constant 0 : index
    %c0_17 = arith.constant 0 : index
    %36 = vector.load %arg5[%c0_16, %c0_17] : memref<1x1xf32, #tpu.memory_space<vmem>>, vector<1x1xf32>
    tpu.vector_store %arg5[%c0_16, %c0_17], %35 {strides = array<i32>} : memref<1x1xf32, #tpu.memory_space<vmem>>, vector<1x1xf32>,
    return
  }
  func.func @transform_0(%arg0: i32) -> (i32, i32) {
    %c0_i32 = arith.constant 0 : i32
    %c0_i32_0 = arith.constant 0 : i32
    %c0_i32_1 = arith.constant 0 : i32
    return %c0_i32, %c0_i32_0 : i32, i32
  }
  func.func @transform_1(%arg0: i32) -> (i32, i32) {
    %c0_i32 = arith.constant 0 : i32
    %c0_i32_0 = arith.constant 0 : i32
    %c0_i32_1 = arith.constant 0 : i32
    return %c0_i32, %c0_i32_0 : i32, i32
  }
  func.func @transform_2(%arg0: i32) -> (i32, i32) {
    %c0_i32 = arith.constant 0 : i32
    %c0_i32_0 = arith.constant 0 : i32
    %c0_i32_1 = arith.constant 0 : i32
    return %c0_i32, %c0_i32_0 : i32, i32
  }
  func.func @transform_3(%arg0: i32) -> (i32, i32) {
    %c0_i32 = arith.constant 0 : i32
    %c0_i32_0 = arith.constant 0 : i32
    %c0_i32_1 = arith.constant 0 : i32
    return %c0_i32, %c0_i32_0 : i32, i32
  }
  func.func @transform_4(%arg0: i32) -> (i32, i32) {
    %c0_i32 = arith.constant 0 : i32
    %c0_i32_0 = arith.constant 0 : i32
    %c0_i32_1 = arith.constant 0 : i32
    return %c0_i32, %c0_i32_0 : i32, i32
  }
  func.func @transform_5(%arg0: i32) -> (i32, i32) {
    %c0_i32 = arith.constant 0 : i32
    %c0_i32_0 = arith.constant 0 : i32
    %c0_i32_1 = arith.constant 0 : i32
    return %c0_i32, %c0_i32_0 : i32, i32
  }
}

</mosaic_0001>

<bundles_post_ra>
// kernel: re_model_forward.12
= control target key start
LH: loop header
LB: loop body
LE: loop exit
PB: predicated region body
PF: predicated region fallthrough
CT: control target
= control target key end

     0   :  { %vm18_vm0 = vcmask 261120   ;;  %vm72_vm1 = vcmask 257024   ;;  %s132_s0 = inlined_call_operand.vmem [shape: bf16[16,32], index: 0, kind: input, shape index: {}]   ;;  %s133_s1 = inlined_call_operand.vmem [shape: f32[1,32], index: 1, kind: input, shape index: {}]   ;;  %s134_s2 = inlined_call_operand.vmem [shape: f32[1,32], index: 2, kind: input, shape index: {}]   ;;  %s135_s3 = inlined_call_operand.vmem [shape: bf16[16,32], index: 3, kind: output, shape index: {}]  }
   0x1   :  { %v86_v0 = vld [vmem:[%s132_s0] sm:$0xff]  }
   0x2   :  { %v87_v1 = vunpack.c.l.bf16 %v86_v0  ;;  %v88_v2 = vunpack.c.h.bf16 %v86_v0  ;;  %v79_v22 = vld [vmem:[%s133_s1] ss:$0 sm:$0xff] }
   0x3   :  { %v80_v24 = vld [vmem:[%s134_s2] ss:$0 sm:$0xff] }
   0x4   :  { %v19_v3 = vsel %vm18_vm0, %v87_v1, 0.0  ;;  %v22_v4 = vsel %vm18_vm0, %v88_v2, 0.0 }
   0x5   :  { %20 = vadd.xlane.f32.xlu0 %v19_v3 }
   0x9   :  { %23 = vadd.xlane.f32.xlu0 %v22_v4 }
  0x8e   :  { %v21_v5 = vpop.xlane.xlu0 %20 }
  0x8f   :  { %v26_v6 = vmul.f32 0.03125, %v21_v5 }
  0x91   :  { %v28_v7 = vsub.f32 %v87_v1, %v26_v6 }
  0x92   :  { %v24_v8 = vpop.xlane.xlu0 %23 }
  0x93   :  { %v27_v9 = vmul.f32 0.03125, %v24_v8  ;;  %v30_v10 = vmul.f32 %v28_v7, %v28_v7 }
  0x95   :  { %v29_v11 = vsub.f32 %v88_v2, %v27_v9  ;;  %v32_v12 = vsel %vm18_vm0, %v30_v10, 0.0 }
  0x96   :  { %33 = vadd.xlane.f32.xlu1 %v32_v12 }
  0x97   :  { %v31_v13 = vmul.f32 %v29_v11, %v29_v11 }
  0x99   :  { %v35_v14 = vsel %vm18_vm0, %v31_v13, 0.0 }
  0x9a   :  { %36 = vadd.xlane.f32.xlu1 %v35_v14 }
 0x11f   :  { %v34_v15 = vpop.xlane.xlu1 %33 }
 0x120   :  { %v38_v16 = vmul.f32 0.03125, %v34_v15 }
 0x122   :  { %v40_v17 = vadd.f32 1e-12, %v38_v16 }
 0x123   :  { %v37_v18 = vpop.xlane.xlu1 %36 }
 0x124   :  { %89 = vrsqrt.f32 %v40_v17  ;;  %v39_v19 = vmul.f32 0.03125, %v37_v18 }
 0x126   :  { %v41_v20 = vadd.f32 1e-12, %v39_v19 }
 0x128   :  { %91 = vrsqrt.f32 %v41_v20 }
 0x131   :  { %v90_v21 = vpop.eup %89 }
 0x132   :  { %v44_v23 = vmul.f32 %v90_v21, %v28_v7 }
 0x134   :  { %v53_v25 = vmul.f32 %v79_v22, %v44_v23 }
 0x135   :  { %v92_v26 = vpop.eup %91 }
 0x136   :  { %v62_v27 = vadd.f32 %v80_v24, %v53_v25  ;;  %v45_v28 = vmul.f32 %v92_v26, %v29_v11 }
 0x138   :  { %v83_v29 = vpack.c.bf16 %v62_v27, %v62_v27  ;;  %v54_v30 = vmul.f32 %v79_v22, %v45_v28 }
 0x13a   :  { %73 = vst.msk [vmem:[%s135_s3] sm:$0xf] %vm72_vm1, %v83_v29  ;;  %v63_v31 = vadd.f32 %v80_v24, %v54_v30 }
 0x13c   :  { %v84_v32 = vpack.c.bf16 %v63_v31, %v63_v31 }
 0x13e   :  { %74 = vst.msk [vmem:[%s135_s3 + $0x4] sm:$0xf] %vm72_vm1, %v84_v32 }

// kernel: re_model_forward.13
= control target key start
LH: loop header
LB: loop body
LE: loop exit
PB: predicated region body
PF: predicated region fallthrough
CT: control target
= control target key end

     0   :  { %vm19_vm0 = vcmask 785408   ;;  %v151_v0 = vmov 0.0   ;;  %vm152_vm1 = vmmov 0   ;;  %vm47_vm2 = vcmask 261120   ;;  %s195_s1 = inlined_call_operand.vmem [shape: bf16[32,96], index: 1, kind: input, shape index: {}]   ;;  %s196_s0 = inlined_call_operand.vmem [shape: bf16[16,32], index: 0, kind: input, shape index: {}]   ;;  %s197_s2 = inlined_call_operand.vmem [shape: f32[1,96], index: 2, kind: input, shape index: {}]   ;;  %s198_s3 = inlined_call_operand.vmem [shape: bf16[16,96], index: 3, kind: output, shape index: {}]  }
   0x1   :  { %138 = vmatprep.subr.bf16.mxu0 %v151_v0  ;;  %v148_v1 = vld [vmem:[%s195_s1 + $0x8] sm:$0xff]   ;;  %142 = vmatprep.mubr.msk.bf16.mxu0 %vm152_vm1, %v151_v0  ;;  %20 = vst.msk [vmem:[#allocation2] sm:$0xff] %vm19_vm0, %v151_v0  ;;  %21 = vst.msk [vmem:[#allocation2 + $0x8] sm:$0xff] %vm19_vm0, %v151_v0  ;;  %v149_v2 = vld [vmem:[%s195_s1] sm:$0xff]   ;;  %vm119_vm3 = vcmask 781312  }
   0x2   :  { %139 = vmatpush3.bf16.msra.mxu0 %v148_v1  ;;  %v150_v3 = vld [vmem:[%s196_s0] sm:$0xff]  }
   0x3   :  { %140 = vmatprep.subr.bf16.mxu0 %v151_v0  ;;  %v130_v12 = vld [vmem:[%s197_s2] ss:$0 sm:$0xff] }
   0x6   :  { %141 = vmatpush3.bf16.msra.mxu0 %v149_v2 }
   0x8   :  { %v22_v4 = vld [vmem:[#allocation2] sm:$0xff]  ;;  %v23_v8 = vld [vmem:[#allocation2 + $0x8] sm:$0xff] }
   0x9   :  { %143 = vmatmul.mubr.msk.bf16.vlgmr.msra.gmra.mxu0 %vm47_vm2, %v150_v3 }
  0xc9   :  { %v85_v5 = vpop.f32.mrf.mxu0 }
  0xca   :  { %v92_v6 = vadd.f32 %v85_v5, %v22_v4 }
  0xcb   :  { %v144_v7 = vpop.f32.mrf.mxu0 }
  0xcc   :  { %95 = vst.msk [vmem:[#allocation2] sm:$0xff] %vm19_vm0, %v92_v6 }
  0xcd   :  { %v88_v9 = vpop.f32.mrf.mxu0 }
  0xce   :  { %v93_v10 = vadd.f32 %v88_v9, %v23_v8 }
  0xcf   :  { %v145_v11 = vpop.f32.mrf.mxu0 }
  0xd0   :  { %96 = vst.msk [vmem:[#allocation2 + $0x8] sm:$0xff] %vm19_vm0, %v93_v10 }
  0xd3   :  { %v100_v13 = vld [vmem:[#allocation2] sm:$0xff] }
  0xd4   :  { %v109_v14 = vadd.f32 %v130_v12, %v100_v13 }
  0xd6   :  { %v133_v15 = vpack.c.bf16 %v109_v14, %v109_v14 }
  0xd7   :  { %v101_v16 = vld [vmem:[#allocation2 + $0x8] sm:$0xff] }
  0xd8   :  { %120 = vst.msk [vmem:[%s198_s3] sm:$0xf] %vm119_vm3, %v133_v15  ;;  %v110_v17 = vadd.f32 %v130_v12, %v101_v16 }
  0xda   :  { %v134_v18 = vpack.c.bf16 %v110_v17, %v110_v17 }
  0xdc   :  { %121 = vst.msk [vmem:[%s198_s3 + $0x4] sm:$0xf] %vm119_vm3, %v134_v18 }

// kernel: re_model_forward.15
= control target key start
LH: loop header
LB: loop body
LE: loop exit
PB: predicated region body
PF: predicated region fallthrough
CT: control target
= control target key end

     0   :  { %vm28_vm0 = vcmask 261120   ;;  %v220_v0 = vmov 0.0   ;;  %vm221_vm1 = vmmov 0   ;;  %vm178_vm2 = vcmask 257024   ;;  %s293_s1 = inlined_call_operand.vmem [shape: bf16[32,32], index: 1, kind: input, shape index: {}]   ;;  %s294_s0 = inlined_call_operand.vmem [shape: bf16[16,32], index: 0, kind: input, shape index: {}]   ;;  %s295_s3 = inlined_call_operand.vmem [shape: bf16[16,32], index: 3, kind: input, shape index: {}]   ;;  %s296_s2 = inlined_call_operand.vmem [shape: f32[1,32], index: 2, kind: input, shape index: {}]   ;;  %s297_s4 = inlined_call_operand.vmem [shape: f32[1,32], index: 4, kind: input, shape index: {}]   ;;  %s298_s5 = inlined_call_operand.vmem [shape: f32[1,32], index: 5, kind: input, shape index: {}]   ;;  %s299_s6 = inlined_call_operand.vmem [shape: bf16[16,32], index: 6, kind: output, shape index: {}]  }
   0x1   :  { %203 = vmatprep.subr.bf16.mxu0 %v220_v0  ;;  %v213_v1 = vld [vmem:[%s293_s1 + $0x8] sm:$0xff]   ;;  %207 = vmatprep.mubr.msk.bf16.mxu0 %vm221_vm1, %v220_v0  ;;  %29 = vst.msk [vmem:[#allocation2] sm:$0xff] %vm28_vm0, %v220_v0  ;;  %30 = vst.msk [vmem:[#allocation2 + $0x8] sm:$0xff] %vm28_vm0, %v220_v0  ;;  %v214_v2 = vld [vmem:[%s293_s1] sm:$0xff]  }
   0x2   :  { %204 = vmatpush3.bf16.msra.mxu0 %v213_v1  ;;  %v215_v3 = vld [vmem:[%s294_s0] sm:$0xff]  }
   0x3   :  { %205 = vmatprep.subr.bf16.mxu0 %v220_v0  ;;  %v197_v12 = vld [vmem:[%s295_s3] sm:$0xff]  }
   0x4   :  { %v189_v13 = vld [vmem:[%s296_s2] ss:$0 sm:$0xff]  ;;  %v198_v14 = vunpack.c.l.bf16 %v197_v12  ;;  %v199_v18 = vunpack.c.h.bf16 %v197_v12 }
   0x5   :  { %v190_v41 = vld [vmem:[%s297_s4] ss:$0 sm:$0xff] }
   0x6   :  { %206 = vmatpush3.bf16.msra.mxu0 %v214_v2  ;;  %v191_v43 = vld [vmem:[%s298_s5] ss:$0 sm:$0xff] }
   0x8   :  { %v31_v4 = vld [vmem:[#allocation2] sm:$0xff]  ;;  %v32_v8 = vld [vmem:[#allocation2 + $0x8] sm:$0xff] }
   0x9   :  { %208 = vmatmul.mubr.msk.bf16.vlgmr.msra.gmra.mxu0 %vm28_vm0, %v215_v3 }
  0xc9   :  { %v94_v5 = vpop.f32.mrf.mxu0 }
  0xca   :  { %v101_v6 = vadd.f32 %v94_v5, %v31_v4 }
  0xcb   :  { %v209_v7 = vpop.f32.mrf.mxu0 }
  0xcc   :  { %103 = vst.msk [vmem:[#allocation2] sm:$0xff] %vm28_vm0, %v101_v6 }
  0xcd   :  { %v97_v9 = vpop.f32.mrf.mxu0 }
  0xce   :  { %v102_v10 = vadd.f32 %v97_v9, %v32_v8 }
  0xcf   :  { %v210_v11 = vpop.f32.mrf.mxu0 }
  0xd0   :  { %104 = vst.msk [vmem:[#allocation2 + $0x8] sm:$0xff] %vm28_vm0, %v102_v10 }
  0xd3   :  { %v108_v15 = vld [vmem:[#allocation2] sm:$0xff] }
  0xd4   :  { %v117_v16 = vadd.f32 %v189_v13, %v108_v15 }
  0xd6   :  { %v123_v17 = vadd.f32 %v198_v14, %v117_v16 }
  0xd7   :  { %v109_v19 = vld [vmem:[#allocation2 + $0x8] sm:$0xff] }
  0xd8   :  { %v125_v20 = vsel %vm28_vm0, %v123_v17, 0.0  ;;  %v118_v21 = vadd.f32 %v189_v13, %v109_v19 }
  0xd9   :  { %126 = vadd.xlane.f32.xlu0 %v125_v20 }
  0xda   :  { %v124_v22 = vadd.f32 %v199_v18, %v118_v21 }
  0xdc   :  { %v128_v23 = vsel %vm28_vm0, %v124_v22, 0.0 }
  0xdd   :  { %129 = vadd.xlane.f32.xlu0 %v128_v23 }
 0x162   :  { %v127_v24 = vpop.xlane.xlu0 %126 }
 0x163   :  { %v132_v25 = vmul.f32 0.03125, %v127_v24 }
 0x165   :  { %v134_v26 = vsub.f32 %v123_v17, %v132_v25 }
 0x166   :  { %v130_v27 = vpop.xlane.xlu0 %129 }
 0x167   :  { %v133_v28 = vmul.f32 0.03125, %v130_v27  ;;  %v136_v29 = vmul.f32 %v134_v26, %v134_v26 }
 0x169   :  { %v135_v30 = vsub.f32 %v124_v22, %v133_v28  ;;  %v138_v31 = vsel %vm28_vm0, %v136_v29, 0.0 }
 0x16a   :  { %139 = vadd.xlane.f32.xlu1 %v138_v31 }
 0x16b   :  { %v137_v32 = vmul.f32 %v135_v30, %v135_v30 }
 0x16d   :  { %v141_v33 = vsel %vm28_vm0, %v137_v32, 0.0 }
 0x16e   :  { %142 = vadd.xlane.f32.xlu1 %v141_v33 }
 0x1f3   :  { %v140_v34 = vpop.xlane.xlu1 %139 }
 0x1f4   :  { %v144_v35 = vmul.f32 0.03125, %v140_v34 }
 0x1f6   :  { %v146_v36 = vadd.f32 1e-12, %v144_v35 }
 0x1f7   :  { %v143_v37 = vpop.xlane.xlu1 %142 }
 0x1f8   :  { %216 = vrsqrt.f32 %v146_v36  ;;  %v145_v38 = vmul.f32 0.03125, %v143_v37 }
 0x1fa   :  { %v147_v39 = vadd.f32 1e-12, %v145_v38 }
 0x1fc   :  { %218 = vrsqrt.f32 %v147_v39 }
 0x205   :  { %v217_v40 = vpop.eup %216 }
 0x206   :  { %v150_v42 = vmul.f32 %v217_v40, %v134_v26 }
 0x208   :  { %v159_v44 = vmul.f32 %v190_v41, %v150_v42 }
 0x209   :  { %v219_v45 = vpop.eup %218 }
 0x20a   :  { %v168_v46 = vadd.f32 %v191_v43, %v159_v44  ;;  %v151_v47 = vmul.f32 %v219_v45, %v135_v30 }
 0x20c   :  { %v194_v48 = vpack.c.bf16 %v168_v46, %v168_v46  ;;  %v160_v49 = vmul.f32 %v190_v41, %v151_v47 }
 0x20e   :  { %179 = vst.msk [vmem:[%s299_s6] sm:$0xf] %vm178_vm2, %v194_v48  ;;  %v169_v50 = vadd.f32 %v191_v43, %v160_v49 }
 0x210   :  { %v195_v51 = vpack.c.bf16 %v169_v50, %v169_v50 }
 0x212   :  { %180 = vst.msk [vmem:[%s299_s6 + $0x4] sm:$0xf] %vm178_vm2, %v195_v51 }

// kernel: re_model_forward.14
= control target key start
LH: loop header
LB: loop body
LE: loop exit
PB: predicated region body
PF: predicated region fallthrough
CT: control target
= control target key end

     0   :  { %s989_s9 = smov 0   ;;  %s991_s10 = smov 0   ;;  %s1115_s0 = inlined_call_operand.vmem [shape: bf16[2,8,96], index: 0, kind: input, shape index: {}]   ;;  %s1116_s1 = inlined_call_operand.vmem [shape: f32[2,1,8], index: 1, kind: input, shape index: {}]   ;;  %s1117_s2 = inlined_call_operand.vmem [shape: bf16[2,8,32], index: 2, kind: output, shape index: {}]  }
   0x1   :  { %s993_s11 = smov 0  }
   0x2 LB: > { %s24_s12 = sadd.s32 1, %s952_s10  ;;  %p781_p0 = scmp.ge.s32.totalorder %s956_s11, 1  ;;  %s956_s11 = sphi %s993_s11, %s12_s11   ;;  %s952_s10 = sphi %s991_s10, %s1119_s10   ;;  %s948_s9 = sphi %s989_s9, %s1118_s9  }
   0x3   : > { %p26_p1 = scmp.ge.s32.totalorder %s24_s12, 2  ;;  %p133_p2 = scmp.lt.s32.totalorder %s956_s11, 3 }
   0x5   : > { %s1121_s12 = smov (%p26_p1, %s24_s12), 0  ;;  %p134_p3 = pnand %p781_p0, %p133_p2 }
   0x6   : > { %p159_p4 = scmp.lt.s32.totalorder (!%p134_p3), %s948_s9, 1  ;;  %s960_s17 = smov (!%p134_p3), 96  }
   0x7   : > { %137 = sbr.rel (%p134_p3) target bundleno = 1541 (0x605), region = 28  ;;  %s961_s18 = smov (!%p134_p3), 64  }
   0x8   : > { %s962_s19 = smov (!%p134_p3), 88   ;;  %s963_s23 = smov (!%p134_p3), 72  }
   0x9   : > { %s964_s24 = smov (!%p134_p3), 120   ;;  %s965_s25 = smov (!%p134_p3), 80  }
   0xa   : > { %s966_s26 = smov (!%p134_p3), 112   ;;  %s967_s27 = smov (!%p134_p3), 104  }
   0xb   : > { %s968_s3 = smov (!%p134_p3), 56   ;;  %s969_s4 = smov (!%p134_p3), 48  }
   0xc   : > { %v958_v0 = vmov 0.0   ;;  %vm959_vm0 = vmmov 0   ;;  %s1123_s9 = smov (!%p159_p4, %s948_s9), 1  ;;  %vm189_vm1 = vcmask 64512   ;;  %v238_v6 = vlaneseq  ;;  %s970_s5 = smov 40  }
   0xd   : > { %823 = vmatprep.subr.bf16.mxu0 %v958_v0  ;;  %825 = vmatprep.mubr.msk.bf16.mxu0 %vm959_vm0, %v958_v0  ;;  %s782_s13 = sshll.u32 %s1123_s9, 2  ;;  %s165_s22 = scalar_lea.vmem %s1116_s1, %s1123_s9  ;;  %vm261_vm2 = vcmask 1043456   ;;  %vm306_vm3 = vcmask 60416   ;;  %vm435_vm4 = vcmask 126016   ;;  %vm564_vm5 = vcmask 191616  }
   0xe   : > { %829 = vmatprep.subr.bf16.mxu1 %v958_v0  ;;  %831 = vmatprep.mubr.msk.bf16.mxu1 %vm959_vm0, %v958_v0  ;;  %s1021_s16 = scalar_lea.vmem %s1115_s0, %s782_s13  ;;  %v175_v7 = vld [vmem:[%s165_s22] sm:$0x1]  ;;  %v239_v9 = vshrl.u32 %v238_v6, 7  ;;  %s1076_s30 = scalar_lea.vmem %s1117_s2, %s782_s13  ;;  %vm693_vm6 = vcmask 257216  }
   0xf   : > { %v911_v1 = vld [vmem:[%s1021_s16] ss:$0 sps:$4 sm:$0xff]   ;;  %v176_v8 = vsub.f32 1.0, %v175_v7  ;;  %s971_s6 = smov 8   ;;  %s972_s7 = smov 16  }
  0x10   : > { %187 = vrot.lane.b32.xlu0 %v911_v1, %s960_s17  ;;  %v182_v4 = vld [vmem:[%s1021_s16] sm:$0xf]  ;;  %256 = vrot.lane.b32.xlu1 %v911_v1, %s961_s18  ;;  %v240_v11 = vsub.s32 0, %v239_v9  ;;  %s973_s8 = smov 24  }
  0x11   : > { %v1031_v5 = vld [vmem:[%s1021_s16] ss:$0 sps:$4 sm:$0xff]   ;;  %v177_v10 = vmul.f32 -10000.0, %v176_v8 }
  0x12   : > { %v1043_v20 = vld [vmem:[%s1021_s16] ss:$0 sps:$4 sm:$0xff]  }
  0x13   : > { %v1038_v12 = vrot.slane %v177_v10, %v240_v11  ;;  %v913_v28 = vld [vmem:[%s1021_s16] ss:$0 sps:$4 sm:$0xff]  }
  0x14   : > { %318 = vrot.lane.b32.xlu1 %v1031_v5, %s962_s19  ;;  %v1051_v29 = vld [vmem:[%s1021_s16] ss:$0 sps:$4 sm:$0xff]  }
  0x15   : > { %v916_v30 = vld [vmem:[%s1021_s16] ss:$0 sps:$4 sm:$0xff]  }
  0x16   : > { %v917_v31 = vld [vmem:[%s1021_s16] ss:$0 sps:$4 sm:$0xff]  }
  0x82   : > { %v188_v2 = vpop.permute.xlu0 %187  ;;  %v257_v21 = vpop.permute.xlu1 %256 }
  0x83   : > { %v194_v3 = vsel %vm189_vm1, %v188_v2, 0  ;;  %v263_v22 = vsel %vm261_vm2, %v257_v21, 0 }
  0x84   : > { %824 = vmatpush3.bf16.xpose.msra.mxu0 %v194_v3  ;;  %830 = vmatpush3.bf16.msra.mxu1 %v263_v22 }
  0x85   : > { %841 = vmatprep.subr.bf16.mxu0 %v958_v0  ;;  %835 = vmatprep.subr.bf16.mxu1 %v958_v0 }
  0x86   : > { %v319_v32 = vpop.permute.xlu1 %318 }
  0x87   : > { %v324_v38 = vsel %vm189_vm1, %v319_v32, 0 }
  0x8b   : > { %826 = vmatmul.mubr.msk.bf16.vlgmr.msra.gmra.mxu0 %vm189_vm1, %v182_v4 }
  0x8c   : > { %843 = vmatprep.mubr.msk.bf16.mxu0 %vm959_vm0, %v958_v0 }
 0x14b   : > { %v230_v13 = vpop.f32.mrf.mxu0 }
 0x14c   : > { %v236_v14 = vmul.f32 0.35355338, %v230_v13 }
 0x14d   : > { %v827_v15 = vpop.f32.mrf.mxu0 }
 0x14e   : > { %v243_v16 = vadd.f32 %v1038_v12, %v236_v14 }
 0x14f   : > { %v233_v17 = vpop.f32.mrf.mxu0 }
 0x150   : > { %v244_v18 = vsel %vm189_vm1, %v243_v16, -inf }
 0x151   : > { %245 = vmax.xlane.f32.xlu0 %v244_v18  ;;  %v828_v19 = vpop.f32.mrf.mxu0 }
 0x167   : > { %576 = vrot.lane.b32.xlu0 %v1043_v20, %s963_s23 }
 0x1da   : > { %v246_v23 = vpop.xlane.xlu0 %245 }
 0x1db   : > { %v247_v24 = vsub.f32 %v243_v16, %v246_v23 }
 0x1dd   : > { %v248_v25 = vmul.f32 1.442695, %v247_v24 }
 0x1de   : > { %v577_v41 = vpop.permute.xlu0 %576 }
 0x1df   : > { %918 = vpow2.f32 %v248_v25  ;;  %v582_v43 = vsel %vm189_vm1, %v577_v41, 0 }
 0x1ec   : > { %v919_v26 = vpop.eup %918 }
 0x1ed   : > { %v250_v27 = vsel %vm189_vm1, %v919_v26, 0.0 }
 0x1ee   : > { %251 = vadd.xlane.f32.xlu1 %v250_v27 }
 0x1ff   : > { %313 = vrot.lane.b32.xlu1 %v913_v28, %s964_s24 }
 0x203   : > { %447 = vrot.lane.b32.xlu1 %v1051_v29, %s965_s25 }
 0x207   : > { %442 = vrot.lane.b32.xlu1 %v916_v30, %s966_s26 }
 0x20b   : > { %571 = vrot.lane.b32.xlu1 %v917_v31, %s967_s27 }
 0x277   : > { %v252_v33 = vpop.xlane.xlu1 %251 }
 0x278   : > { %920 = vrcp.f32 %v252_v33 }
 0x27b   : > { %v314_v36 = vpop.permute.xlu1 %313 }
 0x27f   : > { %v448_v39 = vpop.permute.xlu1 %447 }
 0x280   : > { %v453_v40 = vsel %vm189_vm1, %v448_v39, 0 }
 0x283   : > { %v443_v42 = vpop.permute.xlu1 %442 }
 0x285   : > { %v921_v34 = vpop.eup %920 }
 0x286   : > { %v254_v35 = vmul.f32 %v921_v34, %v919_v26 }
 0x287   : > { %v572_v44 = vpop.permute.xlu1 %571 }
 0x288   : > { %v255_v37 = vpack.c.bf16 %v254_v35, %v254_v35 }
 0x28a   : > { %832 = vmatmul.mubr.msk.bf16.vlgmr.msra.gmra.mxu1 %vm189_vm1, %v255_v37 }
 0x28b   : > { %836 = vmatpush3.bf16.xpose.msra.mxu1 %v324_v38  ;;  %837 = vmatprep.mubr.msk.bf16.mxu1 %vm959_vm0, %v958_v0 }
 0x28c   : > { %847 = vmatprep.subr.bf16.mxu1 %v958_v0 }
 0x292   : > { %838 = vmatmul.mubr.msk.bf16.vlgmr.msra.gmra.mxu1 %vm189_vm1, %v314_v36 }
 0x293   : > { %848 = vmatpush3.bf16.xpose.msra.mxu1 %v453_v40  ;;  %849 = vmatprep.mubr.msk.bf16.mxu1 %vm959_vm0, %v958_v0 }
 0x294   : > { %859 = vmatprep.subr.bf16.mxu1 %v958_v0 }
 0x29a   : > { %850 = vmatmul.mubr.msk.bf16.vlgmr.msra.gmra.mxu1 %vm189_vm1, %v443_v42 }
 0x29b   : > { %860 = vmatpush3.bf16.xpose.msra.mxu1 %v582_v43  ;;  %861 = vmatprep.mubr.msk.bf16.mxu1 %vm959_vm0, %v958_v0 }
 0x2a2   : > { %862 = vmatmul.mubr.msk.bf16.vlgmr.msra.gmra.mxu1 %vm189_vm1, %v572_v44 }
 0x34a   : > { %v299_v45 = vpop.f32.mrf.mxu1 }
 0x34b   : > { %v305_v46 = vpack.c.bf16 %v299_v45, %v299_v45 }
 0x34c   : > { %v833_v47 = vpop.f32.mrf.mxu1 }
 0x34d   : > { %307 = vst.msk [vmem:[%s1076_s30] sm:$0xf] %vm306_vm3, %v305_v46 }
 0x34e   : > { %v302_v48 = vpop.f32.mrf.mxu1 }
 0x350   : > { %v834_v49 = vpop.f32.mrf.mxu1 }
 0x352   : > { %v360_v50 = vpop.f32.mrf.mxu1 }
 0x353   : > { %v366_v51 = vmul.f32 0.35355338, %v360_v50 }
 0x354   : > { %v839_v52 = vpop.f32.mrf.mxu1 }
 0x355   : > { %v367_v53 = vadd.f32 %v366_v51, %v1038_v12 }
 0x356   : > { %v363_v54 = vpop.f32.mrf.mxu1 }
 0x357   : > { %v368_v55 = vsel %vm189_vm1, %v367_v53, -inf }
 0x358   : > { %369 = vmax.xlane.f32.xlu1 %v368_v55  ;;  %v840_v56 = vpop.f32.mrf.mxu1 }
 0x35a   : > { %v489_v57 = vpop.f32.mrf.mxu1 }
 0x35b   : > { %v495_v58 = vmul.f32 0.35355338, %v489_v57 }
 0x35c   : > { %v851_v59 = vpop.f32.mrf.mxu1 }
 0x35d   : > { %v496_v60 = vadd.f32 %v495_v58, %v1038_v12 }
 0x35e   : > { %v492_v61 = vpop.f32.mrf.mxu1 }
 0x35f   : > { %v497_v62 = vsel %vm189_vm1, %v496_v60, -inf }
 0x360   : > { %498 = vmax.xlane.f32.xlu0 %v497_v62  ;;  %v852_v63 = vpop.f32.mrf.mxu1 }
 0x362   : > { %v618_v1 = vpop.f32.mrf.mxu1 }
 0x363   : > { %v624_v2 = vmul.f32 0.35355338, %v618_v1 }
 0x364   : > { %v863_v3 = vpop.f32.mrf.mxu1 }
 0x365   : > { %v625_v4 = vadd.f32 %v624_v2, %v1038_v12 }
 0x366   : > { %v621_v6 = vpop.f32.mrf.mxu1 }
 0x367   : > { %v626_v7 = vsel %vm189_vm1, %v625_v4, -inf }
 0x368   : > { %627 = vmax.xlane.f32.xlu1 %v626_v7  ;;  %v864_v8 = vpop.f32.mrf.mxu1 }
 0x3e1   : > { %v370_v9 = vpop.xlane.xlu1 %369 }
 0x3e2   : > { %v371_v10 = vsub.f32 %v367_v53, %v370_v9 }
 0x3e4   : > { %v372_v11 = vmul.f32 1.442695, %v371_v10 }
 0x3e6   : > { %922 = vpow2.f32 %v372_v11 }
 0x3e9   : > { %v499_v19 = vpop.xlane.xlu0 %498 }
 0x3ea   : > { %v500_v21 = vsub.f32 %v496_v60, %v499_v19 }
 0x3ec   : > { %v501_v22 = vmul.f32 1.442695, %v500_v21 }
 0x3f1   : > { %v628_v13 = vpop.xlane.xlu1 %627 }
 0x3f2   : > { %v629_v14 = vsub.f32 %v625_v4, %v628_v13 }
 0x3f3   : > { %v923_v15 = vpop.eup %922 }
 0x3f4   : > { %v630_v16 = vmul.f32 1.442695, %v629_v14  ;;  %v374_v17 = vsel %vm189_vm1, %v923_v15, 0.0 }
 0x3f5   : > { %375 = vadd.xlane.f32.xlu1 %v374_v17 }
 0x3f6   : > { %924 = vpow2.f32 %v630_v16 }
 0x3f7   : > { %926 = vpow2.f32 %v501_v22 }
 0x403   : > { %v925_v18 = vpop.eup %924 }
 0x404   : > { %v632_v12 = vsel %vm189_vm1, %v925_v18, 0.0  ;;  %v927_v23 = vpop.eup %926 }
 0x405   : > { %633 = vadd.xlane.f32.xlu0 %v632_v12  ;;  %v503_v24 = vsel %vm189_vm1, %v927_v23, 0.0 }
 0x406   : > { %380 = vrot.lane.b32.xlu1 %v1031_v5, %s968_s3 }
 0x41b   : > { %509 = vrot.lane.b32.xlu0 %v1051_v29, %s969_s4 }
 0x42a   : > { %504 = vadd.xlane.f32.xlu1 %v503_v24 }
 0x43b   : > { %638 = vrot.lane.b32.xlu1 %v1043_v20, %s970_s5 }
 0x47e   : > { %v376_v25 = vpop.xlane.xlu1 %375 }
 0x47f   : > { %928 = vrcp.f32 %v376_v25 }
 0x482   : > { %v381_v26 = vpop.permute.xlu1 %380 }
 0x483   : > { %v386_v27 = vsel %vm261_vm2, %v381_v26, 0 }
 0x484   : > { %842 = vmatpush3.bf16.msra.mxu0 %v386_v27 }
 0x485   : > { %853 = vmatprep.subr.bf16.mxu0 %v958_v0 }
 0x48c   : > { %v929_v5 = vpop.eup %928 }
 0x48d   : > { %v378_v28 = vmul.f32 %v929_v5, %v923_v15 }
 0x48e   : > { %v634_v30 = vpop.xlane.xlu0 %633 }
 0x48f   : > { %v379_v31 = vpack.c.bf16 %v378_v28, %v378_v28 }
 0x491   : > { %844 = vmatmul.mubr.msk.bf16.vlgmr.msra.gmra.mxu0 %vm189_vm1, %v379_v31 }
 0x492   : > { %v510_v29 = vpop.permute.xlu0 %509  ;;  %855 = vmatprep.mubr.msk.bf16.mxu0 %vm959_vm0, %v958_v0 }
 0x493   : > { %v515_v20 = vsel %vm261_vm2, %v510_v29, 0 }
 0x494   : > { %854 = vmatpush3.bf16.msra.mxu0 %v515_v20 }
 0x495   : > { %865 = vmatprep.subr.bf16.mxu0 %v958_v0 }
 0x4b3   : > { %v505_v32 = vpop.xlane.xlu1 %504 }
 0x4b4   : > { %930 = vrcp.f32 %v505_v32 }
 0x4b5   : > { %932 = vrcp.f32 %v634_v30 }
 0x4b7   : > { %v639_v34 = vpop.permute.xlu1 %638 }
 0x4b8   : > { %v644_v36 = vsel %vm261_vm2, %v639_v34, 0 }
 0x4c1   : > { %v931_v33 = vpop.eup %930 }
 0x4c2   : > { %v507_v35 = vmul.f32 %v931_v33, %v927_v23  ;;  %v933_v38 = vpop.eup %932 }
 0x4c3   : > { %v636_v39 = vmul.f32 %v933_v38, %v925_v18 }
 0x4c4   : > { %v508_v37 = vpack.c.bf16 %v507_v35, %v507_v35 }
 0x4c5   : > { %v637_v40 = vpack.c.bf16 %v636_v39, %v636_v39 }
 0x4c6   : > { %856 = vmatmul.mubr.msk.bf16.vlgmr.msra.gmra.mxu0 %vm189_vm1, %v508_v37 }
 0x4c7   : > { %866 = vmatpush3.bf16.msra.mxu0 %v644_v36  ;;  %867 = vmatprep.mubr.msk.bf16.mxu0 %vm959_vm0, %v958_v0 }
 0x4ce   : > { %868 = vmatmul.mubr.msk.bf16.vlgmr.msra.gmra.mxu0 %vm189_vm1, %v637_v40 }
 0x551   : > { %v422_v41 = vpop.f32.mrf.mxu0 }
 0x552   : > { %v804_v42 = vpack.c.bf16 %v422_v41, %v422_v41 }
 0x553   : > { %v845_v43 = vpop.f32.mrf.mxu0 }
 0x554   : > { %432 = vrot.lane.b32.xlu1 %v804_v42, %s971_s6 }
 0x555   : > { %v425_v44 = vpop.f32.mrf.mxu0 }
 0x557   : > { %v846_v45 = vpop.f32.mrf.mxu0 }
 0x586   : > { %v551_v46 = vpop.f32.mrf.mxu0 }
 0x587   : > { %v805_v47 = vpack.c.bf16 %v551_v46, %v551_v46 }
 0x588   : > { %v857_v48 = vpop.f32.mrf.mxu0 }
 0x589   : > { %561 = vrot.lane.b32.xlu0 %v805_v47, %s972_s7 }
 0x58a   : > { %v554_v49 = vpop.f32.mrf.mxu0 }
 0x58c   : > { %v858_v0 = vpop.f32.mrf.mxu0 }
 0x58e   : > { %v680_v50 = vpop.f32.mrf.mxu0 }
 0x58f   : > { %v806_v51 = vpack.c.bf16 %v680_v50, %v680_v50 }
 0x590   : > { %v869_v52 = vpop.f32.mrf.mxu0 }
 0x591   : > { %690 = vrot.lane.b32.xlu1 %v806_v51, %s973_s8 }
 0x592   : > { %v683_v53 = vpop.f32.mrf.mxu0 }
 0x594   : > { %v870_v54 = vpop.f32.mrf.mxu0 }
 0x5c6   : > { %v433_v55 = vpop.permute.xlu1 %432 }
 0x5c7   : > { %436 = vst.msk [vmem:[%s1076_s30] sm:$0xf] %vm435_vm4, %v433_v55 }
 0x5fb   : > { %v562_v56 = vpop.permute.xlu0 %561 }
 0x5fc   : > { %565 = vst.msk [vmem:[%s1076_s30] sm:$0xf] %vm564_vm5, %v562_v56 }
 0x603   : > { %v691_v57 = vpop.permute.xlu1 %690 }
 0x604   : > { %694 = vst.msk [vmem:[%s1076_s30] sm:$0xf] %vm693_vm6, %v691_v57 }
 0x605 PF: > { %s12_s11 = sadd.s32 1, %s956_s11   ;;  %s1118_s9 = smov %s952_s10 }
 0x606   : > { %p9_p5 = scmp.ge.s32.totalorder %s12_s11, 4   ;;  %s1119_s10 = smov %s1121_s12 }
 0x608   :  { %11 = sbr.rel (!%p9_p5) target bundleno = 2 (0x2), region = 62 }

// kernel: re_model_forward.16
= control target key start
LH: loop header
LB: loop body
LE: loop exit
PB: predicated region body
PF: predicated region fallthrough
CT: control target
= control target key end

     0   :  { %vm19_vm0 = vcmask 523264   ;;  %v173_v0 = vmov 0.0   ;;  %vm174_vm1 = vmmov 0   ;;  %vm47_vm2 = vcmask 261120   ;;  %s217_s1 = inlined_call_operand.vmem [shape: bf16[32,64], index: 1, kind: input, shape index: {}]   ;;  %s218_s0 = inlined_call_operand.vmem [shape: bf16[16,32], index: 0, kind: input, shape index: {}]   ;;  %s219_s2 = inlined_call_operand.vmem [shape: f32[1,64], index: 2, kind: input, shape index: {}]   ;;  %s220_s3 = inlined_call_operand.vmem [shape: bf16[16,64], index: 3, kind: output, shape index: {}]  }
   0x1   :  { %156 = vmatprep.subr.bf16.mxu0 %v173_v0  ;;  %v166_v1 = vld [vmem:[%s217_s1 + $0x8] sm:$0xff]   ;;  %160 = vmatprep.mubr.msk.bf16.mxu0 %vm174_vm1, %v173_v0  ;;  %20 = vst.msk [vmem:[#allocation2] sm:$0xff] %vm19_vm0, %v173_v0  ;;  %21 = vst.msk [vmem:[#allocation2 + $0x8] sm:$0xff] %vm19_vm0, %v173_v0  ;;  %v167_v2 = vld [vmem:[%s217_s1] sm:$0xff]   ;;  %vm137_vm3 = vcmask 519168  }
   0x2   :  { %157 = vmatpush3.bf16.msra.mxu0 %v166_v1  ;;  %v168_v3 = vld [vmem:[%s218_s0] sm:$0xff]  }
   0x3   :  { %158 = vmatprep.subr.bf16.mxu0 %v173_v0  ;;  %v148_v12 = vld [vmem:[%s219_s2] ss:$0 sm:$0xff] }
   0x6   :  { %159 = vmatpush3.bf16.msra.mxu0 %v167_v2 }
   0x8   :  { %v22_v4 = vld [vmem:[#allocation2] sm:$0xff]  ;;  %v23_v8 = vld [vmem:[#allocation2 + $0x8] sm:$0xff] }
   0x9   :  { %161 = vmatmul.mubr.msk.bf16.vlgmr.msra.gmra.mxu0 %vm47_vm2, %v168_v3 }
  0xc9   :  { %v85_v5 = vpop.f32.mrf.mxu0 }
  0xca   :  { %v92_v6 = vadd.f32 %v85_v5, %v22_v4 }
  0xcb   :  { %v162_v7 = vpop.f32.mrf.mxu0 }
  0xcc   :  { %95 = vst.msk [vmem:[#allocation2] sm:$0xff] %vm19_vm0, %v92_v6 }
  0xcd   :  { %v88_v9 = vpop.f32.mrf.mxu0 }
  0xce   :  { %v93_v10 = vadd.f32 %v88_v9, %v23_v8 }
  0xcf   :  { %v163_v11 = vpop.f32.mrf.mxu0 }
  0xd0   :  { %96 = vst.msk [vmem:[#allocation2 + $0x8] sm:$0xff] %vm19_vm0, %v93_v10 }
  0xd3   :  { %v100_v13 = vld [vmem:[#allocation2] sm:$0xff] }
  0xd4   :  { %v109_v14 = vadd.f32 %v148_v12, %v100_v13 }
  0xd6   :  { %v113_v15 = vmul.f32 0.044715, %v109_v14  ;;  %v111_v28 = vmul.f32 0.5, %v109_v14 }
  0xd7   :  { %v101_v16 = vld [vmem:[#allocation2 + $0x8] sm:$0xff] }
  0xd8   :  { %v115_v17 = vmul.f32 %v113_v15, %v109_v14  ;;  %v110_v18 = vadd.f32 %v148_v12, %v101_v16 }
  0xda   :  { %v117_v19 = vmul.f32 %v115_v17, %v109_v14  ;;  %v114_v20 = vmul.f32 0.044715, %v110_v18  ;;  %v112_v33 = vmul.f32 0.5, %v110_v18 }
  0xdc   :  { %v119_v21 = vadd.f32 %v117_v19, %v109_v14  ;;  %v116_v22 = vmul.f32 %v114_v20, %v110_v18 }
  0xde   :  { %v121_v23 = vmul.f32 0.7978846, %v119_v21  ;;  %v118_v24 = vmul.f32 %v116_v22, %v110_v18 }
  0xe0   :  { %169 = vtanh.f32 %v121_v23  ;;  %v120_v25 = vadd.f32 %v118_v24, %v110_v18 }
  0xe2   :  { %v122_v26 = vmul.f32 0.7978846, %v120_v25 }
  0xe4   :  { %171 = vtanh.f32 %v122_v26 }
  0xed   :  { %v170_v27 = vpop.eup %169 }
  0xee   :  { %v125_v29 = vadd.f32 1.0, %v170_v27 }
  0xf0   :  { %v127_v30 = vmul.f32 %v125_v29, %v111_v28 }
  0xf1   :  { %v172_v31 = vpop.eup %171 }
  0xf2   :  { %v151_v32 = vpack.c.bf16 %v127_v30, %v127_v30  ;;  %v126_v34 = vadd.f32 1.0, %v172_v31 }
  0xf4   :  { %138 = vst.msk [vmem:[%s220_s3] sm:$0xf] %vm137_vm3, %v151_v32  ;;  %v128_v35 = vmul.f32 %v126_v34, %v112_v33 }
  0xf6   :  { %v152_v36 = vpack.c.bf16 %v128_v35, %v128_v35 }
  0xf8   :  { %139 = vst.msk [vmem:[%s220_s3 + $0x4] sm:$0xf] %vm137_vm3, %v152_v36 }

// kernel: re_model_forward.17
= control target key start
LH: loop header
LB: loop body
LE: loop exit
PB: predicated region body
PF: predicated region fallthrough
CT: control target
= control target key end

     0   :  { %vm28_vm0 = vcmask 261120   ;;  %v247_v0 = vmov 0.0   ;;  %vm248_vm1 = vmmov 0   ;;  %vm72_vm2 = vcmask 523264   ;;  %s325_s1 = inlined_call_operand.vmem [shape: bf16[64,32], index: 1, kind: input, shape index: {}]   ;;  %s326_s0 = inlined_call_operand.vmem [shape: bf16[16,64], index: 0, kind: input, shape index: {}]   ;;  %s327_s3 = inlined_call_operand.vmem [shape: bf16[16,32], index: 3, kind: input, shape index: {}]   ;;  %s328_s2 = inlined_call_operand.vmem [shape: f32[1,32], index: 2, kind: input, shape index: {}]   ;;  %s329_s4 = inlined_call_operand.vmem [shape: f32[1,32], index: 4, kind: input, shape index: {}]   ;;  %s330_s5 = inlined_call_operand.vmem [shape: f32[1,32], index: 5, kind: input, shape index: {}]   ;;  %s331_s6 = inlined_call_operand.vmem [shape: bf16[16,32], index: 6, kind: output, shape index: {}]  }
   0x1   :  { %224 = vmatprep.subr.bf16.mxu0 %v247_v0  ;;  %v238_v1 = vld [vmem:[%s325_s1 + $0x18] sm:$0xff]   ;;  %232 = vmatprep.mubr.msk.bf16.mxu0 %vm248_vm1, %v247_v0  ;;  %29 = vst.msk [vmem:[#allocation2] sm:$0xff] %vm28_vm0, %v247_v0  ;;  %30 = vst.msk [vmem:[#allocation2 + $0x8] sm:$0xff] %vm28_vm0, %v247_v0  ;;  %v239_v2 = vld [vmem:[%s325_s1 + $0x10] sm:$0xff]   ;;  %vm195_vm3 = vcmask 257024  }
   0x2   :  { %225 = vmatpush3.bf16.msra.mxu0 %v238_v1  ;;  %v240_v3 = vld [vmem:[%s325_s1 + $0x8] sm:$0xff]   ;;  %v241_v4 = vld [vmem:[%s325_s1] sm:$0xff]  }
   0x3   :  { %226 = vmatprep.subr.bf16.mxu0 %v247_v0  ;;  %v242_v5 = vld [vmem:[%s326_s0] sm:$0xff]  }
   0x4   :  { %v216_v14 = vld [vmem:[%s327_s3] sm:$0xff]  }
   0x5   :  { %v208_v15 = vld [vmem:[%s328_s2] ss:$0 sm:$0xff]  ;;  %v217_v16 = vunpack.c.l.bf16 %v216_v14  ;;  %v218_v20 = vunpack.c.h.bf16 %v216_v14 }
   0x6   :  { %227 = vmatpush3.bf16.msra.mxu0 %v239_v2  ;;  %v209_v43 = vld [vmem:[%s329_s4] ss:$0 sm:$0xff] }
   0x7   :  { %228 = vmatprep.subr.bf16.mxu0 %v247_v0  ;;  %v210_v45 = vld [vmem:[%s330_s5] ss:$0 sm:$0xff] }
   0x8   :  { %v31_v6 = vld [vmem:[#allocation2] sm:$0xff]  ;;  %v32_v10 = vld [vmem:[#allocation2 + $0x8] sm:$0xff] }
   0xa   :  { %229 = vmatpush3.bf16.msra.mxu0 %v240_v3 }
   0xb   :  { %230 = vmatprep.subr.bf16.mxu0 %v247_v0 }
   0xe   :  { %231 = vmatpush3.bf16.msra.mxu0 %v241_v4 }
  0x11   :  { %233 = vmatmul.mubr.msk.bf16.vlgmr.msra.gmra.mxu0 %vm72_vm2, %v242_v5 }
  0xd1   :  { %v110_v7 = vpop.f32.mrf.mxu0 }
  0xd2   :  { %v117_v8 = vadd.f32 %v110_v7, %v31_v6 }
  0xd3   :  { %v234_v9 = vpop.f32.mrf.mxu0 }
  0xd4   :  { %120 = vst.msk [vmem:[#allocation2] sm:$0xff] %vm28_vm0, %v117_v8 }
  0xd5   :  { %v113_v11 = vpop.f32.mrf.mxu0 }
  0xd6   :  { %v118_v12 = vadd.f32 %v113_v11, %v32_v10 }
  0xd7   :  { %v235_v13 = vpop.f32.mrf.mxu0 }
  0xd8   :  { %121 = vst.msk [vmem:[#allocation2 + $0x8] sm:$0xff] %vm28_vm0, %v118_v12 }
  0xdb   :  { %v125_v17 = vld [vmem:[#allocation2] sm:$0xff] }
  0xdc   :  { %v134_v18 = vadd.f32 %v208_v15, %v125_v17 }
  0xde   :  { %v140_v19 = vadd.f32 %v217_v16, %v134_v18 }
  0xdf   :  { %v126_v21 = vld [vmem:[#allocation2 + $0x8] sm:$0xff] }
  0xe0   :  { %v142_v22 = vsel %vm28_vm0, %v140_v19, 0.0  ;;  %v135_v23 = vadd.f32 %v208_v15, %v126_v21 }
  0xe1   :  { %143 = vadd.xlane.f32.xlu0 %v142_v22 }
  0xe2   :  { %v141_v24 = vadd.f32 %v218_v20, %v135_v23 }
  0xe4   :  { %v145_v25 = vsel %vm28_vm0, %v141_v24, 0.0 }
  0xe5   :  { %146 = vadd.xlane.f32.xlu0 %v145_v25 }
 0x16a   :  { %v144_v26 = vpop.xlane.xlu0 %143 }
 0x16b   :  { %v149_v27 = vmul.f32 0.03125, %v144_v26 }
 0x16d   :  { %v151_v28 = vsub.f32 %v140_v19, %v149_v27 }
 0x16e   :  { %v147_v29 = vpop.xlane.xlu0 %146 }
 0x16f   :  { %v150_v30 = vmul.f32 0.03125, %v147_v29  ;;  %v153_v31 = vmul.f32 %v151_v28, %v151_v28 }
 0x171   :  { %v152_v32 = vsub.f32 %v141_v24, %v150_v30  ;;  %v155_v33 = vsel %vm28_vm0, %v153_v31, 0.0 }
 0x172   :  { %156 = vadd.xlane.f32.xlu1 %v155_v33 }
 0x173   :  { %v154_v34 = vmul.f32 %v152_v32, %v152_v32 }
 0x175   :  { %v158_v35 = vsel %vm28_vm0, %v154_v34, 0.0 }
 0x176   :  { %159 = vadd.xlane.f32.xlu1 %v158_v35 }
 0x1fb   :  { %v157_v36 = vpop.xlane.xlu1 %156 }
 0x1fc   :  { %v161_v37 = vmul.f32 0.03125, %v157_v36 }
 0x1fe   :  { %v163_v38 = vadd.f32 1e-12, %v161_v37 }
 0x1ff   :  { %v160_v39 = vpop.xlane.xlu1 %159 }
 0x200   :  { %243 = vrsqrt.f32 %v163_v38  ;;  %v162_v40 = vmul.f32 0.03125, %v160_v39 }
 0x202   :  { %v164_v41 = vadd.f32 1e-12, %v162_v40 }
 0x204   :  { %245 = vrsqrt.f32 %v164_v41 }
 0x20d   :  { %v244_v42 = vpop.eup %243 }
 0x20e   :  { %v167_v44 = vmul.f32 %v244_v42, %v151_v28 }
 0x210   :  { %v176_v46 = vmul.f32 %v209_v43, %v167_v44 }
 0x211   :  { %v246_v47 = vpop.eup %245 }
 0x212   :  { %v185_v48 = vadd.f32 %v210_v45, %v176_v46  ;;  %v168_v49 = vmul.f32 %v246_v47, %v152_v32 }
 0x214   :  { %v213_v50 = vpack.c.bf16 %v185_v48, %v185_v48  ;;  %v177_v51 = vmul.f32 %v209_v43, %v168_v49 }
 0x216   :  { %196 = vst.msk [vmem:[%s331_s6] sm:$0xf] %vm195_vm3, %v213_v50  ;;  %v186_v52 = vadd.f32 %v210_v45, %v177_v51 }
 0x218   :  { %v214_v53 = vpack.c.bf16 %v186_v52, %v186_v52 }
 0x21a   :  { %197 = vst.msk [vmem:[%s331_s6 + $0x4] sm:$0xf] %vm195_vm3, %v214_v53 }

// kernel: re_model_forward.23
= control target key start
LH: loop header
LB: loop body
LE: loop exit
PB: predicated region body
PF: predicated region fallthrough
CT: control target
= control target key end

     0   :  { %v246_v1 = vmov 0.0   ;;  %vm247_vm0 = vmmov 0   ;;  %s323_s0 = inlined_call_operand.vmem [shape: bf16[2,64], index: 0, kind: input, shape index: {}]   ;;  %s324_s1 = inlined_call_operand.vmem [shape: f32[64,5], index: 1, kind: input, shape index: {}]   ;;  %s325_s2 = inlined_call_operand.vmem [shape: f32[1,5], index: 2, kind: input, shape index: {}]   ;;  %s326_s3 = inlined_call_operand.vmem [shape: s32[2,1], index: 3, kind: input, shape index: {}]   ;;  %s327_s4 = inlined_call_operand.hbm [shape: f32[1,1], index: 4, kind: output, shape index: {0}]   ;;  %s328_s5 = inlined_call_operand.vmem [shape: s32[2,1], index: 5, kind: output, shape index: {1}]  }
   0x1   :  { %v29_v0 = vld [vmem:[%s324_s1 + $0x38] sm:$0xff]  ;;  %196 = vmatprep.subr.mxu0 %v246_v1  ;;  %v28_v2 = vld [vmem:[%s324_s1 + $0x30] sm:$0xff]  ;;  %212 = vmatprep.mubr.msk.f32.mxu0 %vm247_vm0, %v246_v1  ;;  %v27_v3 = vld [vmem:[%s324_s1 + $0x28] sm:$0xff] }
   0x2   :  { %197 = vmatpush3.msra.mxu0 %v29_v0 }
   0x3   :  { %198 = vmatprep.subr.mxu0 %v246_v1 }
   0x4   :  { %11 = vsyncpa [#allocation3], 0  ;;  %199 = vmatpush3.msra.mxu0 %v28_v2  ;;  %v26_v4 = vld [vmem:[%s324_s1 + $0x20] sm:$0xff]  ;;  %v25_v5 = vld [vmem:[%s324_s1 + $0x18] sm:$0xff]  ;;  %vm37_vm1 = vcmask 523264   ;;  %v248_v11 = vmov 0   ;;  %v111_v18 = vlaneseq }
   0x5   :  { %200 = vmatprep.subr.mxu0 %v246_v1  ;;  %v24_v6 = vld [vmem:[%s324_s1 + $0x10] sm:$0xff]  ;;  %v20_v7 = vld [vmem:[%s323_s0] sm:$0x1]  ;;  %v23_v8 = vld [vmem:[%s324_s1 + $0x8] sm:$0xff]  ;;  %219 = vset.pattern.permute.xlu0 %v248_v11  ;;  %vm113_vm2 = vcmask 33792   ;;  %vm155_vm6 = vcmask 1041408  }
   0x6   :  { %201 = vmatpush3.msra.mxu0 %v27_v3  ;;  %v22_v9 = vld [vmem:[%s324_s1] sm:$0xff]  ;;  %v21_v10 = vunpack.c.l.bf16 %v20_v7  ;;  %v112_v19 = vand.u32 127, %v111_v18  ;;  %vm165_vm7 = vcmask 0  }
   0x7   :  { %202 = vmatprep.subr.mxu0 %v246_v1  ;;  %v185_v12 = vld [vmem:[%s325_s2] ss:$0 sm:$0xff]  ;;  %s249_s2 = smov [#allocation2]  }
   0x8   :  { %203 = vmatpush3.msra.mxu0 %v26_v4  ;;  %v136_v17 = vld [vmem:[%s326_s3] sm:$0x3]  ;;  %s173_s3 = sshll.u32 %s249_s2, 4  ;;  %s174_s3 = int_to_ptr.vmem [resolvable:$true] %s173_s3 }
   0x9   :  { %204 = vmatprep.subr.mxu0 %v246_v1  ;;  %s224_s13 = scalar_lea.vmem %s174_s3, 16  ;;  %s228_s14 = scalar_lea.vmem %s174_s3, 32 }
   0xa   :  { %205 = vmatpush3.msra.mxu0 %v25_v5  ;;  %p225_p0 = scmp.ne.s32.totalorder %s174_s3, %s224_s13  ;;  %p229_p1 = scmp.lt.s32.totalorder %s174_s3, %s174_s3 }
   0xb   :  { %206 = vmatprep.subr.mxu0 %v246_v1  ;;  %p230_p2 = scmp.lt.s32.totalorder %s228_s14, %s224_s13 }
   0xc   :  { %207 = vmatpush3.msra.mxu0 %v24_v6 }
   0xd   :  { %208 = vmatprep.subr.mxu0 %v246_v1  ;;  %p231_p3 = por %p230_p2, %p229_p1 }
   0xe   :  { %209 = vmatpush3.msra.mxu0 %v23_v8 }
   0xf   :  { %210 = vmatprep.subr.mxu0 %v246_v1  ;;  %p232_p4 = pnand %p231_p3, %p225_p0 }
  0x10   :  { %211 = vmatpush3.msra.mxu0 %v22_v9 }
  0x11   :  { %213 = vmatmul.mubr.msk.f32.vlgmr.msra.gmra.mxu0 %vm37_vm1, %v21_v10 }
  0xd1   :  { %v107_v13 = vpop.f32.mrf.mxu0 }
  0xd2   :  { %v108_v14 = vadd.f32 %v185_v12, %v107_v13 }
  0xd3   :  { %v214_v15 = vpop.f32.mrf.mxu0 }
  0xd4   :  { %v114_v16 = vsel %vm113_vm2, %v108_v14, -inf }
  0xd5   :  { %115 = vmax.xlane.f32.xlu0 %v114_v16 }
  0xeb   :  { %147 = vperm.xlu0 %219, %v136_v17  }
 0x15e   :  { %v116_v20 = vpop.xlane.xlu0 %115 }
 0x15f   :  { %vm117_vm3 = vcmp.eq.f32.partialorder %v108_v14, %v116_v20  ;;  %v137_v21 = vsub.f32 %v108_v14, %v116_v20 }
 0x160   :  { %v118_v22 = vsel %vm117_vm3, %v112_v19, 5 }
 0x161   :  { %v138_v23 = vmul.f32 1.442695, %v137_v21  ;;  %v119_v24 = vsel %vm113_vm2, %v118_v22, 2147483647 }
 0x162   :  { %v121_v25 = vshra.s32 %v119_v24, 16  ;;  %v120_v32 = vand.u32 65535, %v119_v24 }
 0x163   :  { %220 = vpow2.f32 %v138_v23 }
 0x164   :  { %v123_v26 = vcvt.s32.f32 %v121_v25  ;;  %v122_v34 = vcvt.s32.f32 %v120_v32 }
 0x166   :  { %124 = vmin.xlane.f32.xlu1 %v123_v26  ;;  %v148_v27 = vpop.permute.xlu0 %147 }
 0x167   :  { %vm149_vm4 = vcmp.eq.s32.totalorder %v112_v19, %v148_v27 }
 0x168   :  { %v150_v30 = vsel %vm149_vm4, %v108_v14, 0.0 }
 0x169   :  { %v151_v31 = vsel %vm113_vm2, %v150_v30, 0.0 }
 0x170   :  { %v221_v28 = vpop.eup %220 }
 0x171   :  { %v140_v29 = vsel %vm113_vm2, %v221_v28, 0.0 }
 0x172   :  { %141 = vadd.xlane.f32.xlu1 %v140_v29 }
 0x176   :  { %152 = vadd.xlane.f32.xlu1 %v151_v31 }
 0x1ef   :  { %v125_v33 = vpop.xlane.xlu1 %124 }
 0x1f0   :  { %vm126_vm5 = vcmp.eq.f32.partialorder %v123_v26, %v125_v33 }
 0x1f1   :  { %v127_v35 = vsel %vm126_vm5, %v122_v34, inf }
 0x1f2   :  { %128 = vmin.xlane.f32.xlu1 %v127_v35 }
 0x1fb   :  { %v142_v36 = vpop.xlane.xlu1 %141 }
 0x1fc   :  { %222 = vlog2.f32 %v142_v36 }
 0x1ff   :  { %v153_v40 = vpop.xlane.xlu1 %152 }
 0x209   :  { %v223_v37 = vpop.eup %222 }
 0x20a   :  { %v144_v38 = vmul.f32 0.6931472, %v223_v37 }
 0x20c   :  { %v145_v39 = vadd.f32 %v144_v38, %v116_v20 }
 0x20e   :  { %v154_v41 = vsub.f32 %v145_v39, %v153_v40 }
 0x210   :  { %v156_v42 = vsel %vm155_vm6, %v154_v41, 0.0 }
 0x211   :  { %v157_v43 = vrot.slane %v156_v42, 4 }
 0x213   :  { %v158_v44 = vadd.f32 %v157_v43, %v156_v42 }
 0x215   :  { %v159_v45 = vrot.slane %v158_v44, 2 }
 0x217   :  { %v160_v46 = vadd.f32 %v159_v45, %v158_v44 }
 0x219   :  { %v161_v47 = vrot.slane %v160_v46, 1 }
 0x21b   :  { %v162_v48 = vadd.f32 %v161_v47, %v160_v46 }
 0x21d   :  { %v164_v49 = vmul.f32 0.5, %v162_v48 }
 0x21f   :  { %166 = vst.msk [vmem:[#allocation2] sm:$0x1] %vm165_vm7, %v164_v49 }
 0x220   :  { %235 = shalt.err (!%p232_p4)
}
 0x221   :  { %176 = dma.vmem_to_hbm [thread:$0]  %s174_s3, 16, %s327_s4, [#allocation3]   ;;  %v131_v50 = vcvt.f32.s32 %v125_v33  ;;  %vm134_vm8 = vcmask 1024  }
 0x223   :  { %v132_v52 = vshll.u32 %v131_v50, 16 }
 0x27b   :  { %v129_v51 = vpop.xlane.xlu1 %128 }
 0x27c   :  { %v130_v53 = vcvt.f32.s32 %v129_v51 }
 0x27e   :  { %v133_v54 = vadd.s32 %v132_v52, %v130_v53 }
 0x280   :  { %135 = vst.msk [vmem:[%s328_s5] sm:$0x3] %vm134_vm8, %v133_v54 }
 0x281   :  { %244 = dma.done.wait [#allocation3], 16  }
 0x282   :  { %245 = vsyncadd [#allocation3], 4294967280 }
 0x283   :  { %184 = vsyncpa [#allocation3], 1 }

</bundles_post_ra>
